<compile_context>
chip_gen: v6e
topology: v6e:2x2x1
jax: 0.10.0
libtpu: 0.0.40
codegen_flags: <defaults>
</compile_context>

<pallas_src>
import functools

import jax
import jax.numpy as jnp
import numpy as np
from jax.experimental import pallas as pl
from jax.experimental.pallas import tpu as pltpu


def _round_up(x, m):
    return ((x + m - 1) // m) * m


def _vq_kernel(x_ref, et_ref, e_ref, e2_ref, q_ref, idx_ref, loss_ref, *,
               tile_n, k_pad, n_valid, mask_rows):
    i = pl.program_id(0)

    x = x_ref[...].astype(jnp.float32)                                   # (tn, Dp)

    # dist' = ||e||^2 - 2 x.e  (per-row ||x||^2 dropped: argmin-invariant).
    # et_ref already holds -2 * E^T; e2_ref holds ||e||^2 with a +huge sentinel on
    # padded codebook rows so they are never selected.
    xe = jnp.dot(x, et_ref[...], preferred_element_type=jnp.float32)     # (tn, Kp) on MXU
    dist = xe + e2_ref[...]                                              # (tn, Kp)

    # argmin over codebook axis (first minimal index on ties, like torch/jnp argmin)
    iota = jax.lax.broadcasted_iota(jnp.int32, dist.shape, 1)            # (tn, Kp)
    dmin = jnp.min(dist, axis=-1, keepdims=True)
    cand = jnp.where(dist == dmin, iota, k_pad)
    idx = jnp.min(cand, axis=-1)                                         # (tn,) int32

    # lane-dense index store: one (1, tile_n) full-width row per grid step
    idx_ref[...] = idx[None, :].astype(jnp.int32)

    # one-hot @ codebook == embedding gather (MXU), matches the torch.matmul path
    onehot = (iota == idx[:, None]).astype(jnp.float32)                  # (tn, Kp)
    q = jnp.dot(onehot, e_ref[...], preferred_element_type=jnp.float32)  # (tn, Dp)
    q_ref[...] = q.astype(q_ref.dtype)

    # raw squared-error partial for this tile, reduced over rows only -> lane-dense
    diff = q - x
    if mask_rows:
        row = jax.lax.broadcasted_iota(jnp.int32, (tile_n, 1), 0) + i * tile_n
        diff = jnp.where(row < n_valid, diff, 0.0)
    loss_ref[...] = jnp.sum(diff * diff, axis=0, keepdims=True)          # (1, Dp)


def vector_quantizer(inputs, embeddings, commitment_cost, *, tile_n=256):
    """Pallas VectorQuantizer forward. Returns (quantized, loss, encoding_indices)."""
    K, D = embeddings.shape
    input_shape = inputs.shape
    assert input_shape[-1] == D, "last dim must equal embedding_dim"

    flat = inputs.reshape(-1, D)
    N = flat.shape[0]

    d_pad = _round_up(D, 128)
    k_pad = _round_up(K, 128)

    # keep tile_n in {128, 256, 512}; shrink when (tile_n, K_pad) f32 intermediates
    # would blow the tighter VMEM budgets (v5e 16 MiB scoped / v7x 64 MiB physical)
    if tile_n >= 512:
        tile_n = 512
    elif tile_n >= 256:
        tile_n = 256
    else:
        tile_n = 128
    while tile_n > 128 and tile_n * k_pad * 4 > (8 << 20):
        tile_n //= 2

    n_pad = _round_up(max(N, 1), tile_n)
    num_tiles = n_pad // tile_n

    f32 = jnp.float32
    # codebook prep hoisted out of the kernel (done once per call, in XLA):
    flat_p = jnp.pad(flat.astype(f32), ((0, n_pad - N), (0, d_pad - D)))
    e_p = jnp.pad(embeddings.astype(f32), ((0, k_pad - K), (0, d_pad - D)))  # (Kp, Dp)
    et_m2 = jnp.transpose(-2.0 * e_p)                                        # (Dp, Kp)
    e2 = jnp.sum(e_p * e_p, axis=-1)                                         # (Kp,)
    e2 = jnp.where(jnp.arange(k_pad) < K, e2, f32(1e30))[None, :]            # (1, Kp)

    scale = (1.0 + float(commitment_cost)) / float(N * D)

    # rough per-step VMEM footprint; raise the scoped limit only when the 32 MiB
    # default would be tight (keeps a safe default on v7x's 64 MiB physical VMEM)
    vmem_est = 4 * (4 * tile_n * d_pad          # x in + q out, double-buffered
                    + 2 * d_pad * k_pad + k_pad  # resident codebooks + ||e||^2
                    + 4 * tile_n * k_pad         # (tn, Kp) f32 intermediates
                    + 2 * tile_n * d_pad)        # diff / loss partials
    vmem_limit = int(min(vmem_est + (8 << 20), 96 << 20)) if vmem_est > (32 << 20) else None

    q_pad, idx_pad, loss_parts = pl.pallas_call(
        functools.partial(_vq_kernel, tile_n=tile_n, k_pad=k_pad,
                          n_valid=N, mask_rows=(n_pad != N)),
        out_shape=(
            jax.ShapeDtypeStruct((n_pad, d_pad), inputs.dtype),   # quantized (padded)
            jax.ShapeDtypeStruct((num_tiles, tile_n), jnp.int32), # indices (lane-dense)
            jax.ShapeDtypeStruct((num_tiles, d_pad), jnp.float32),# per-tile loss partials
        ),
        grid_spec=pltpu.PrefetchScalarGridSpec(
            num_scalar_prefetch=0,
            grid=(num_tiles,),
            in_specs=[
                pl.BlockSpec((tile_n, d_pad), lambda i: (i, 0)),   # flat input tile
                pl.BlockSpec((d_pad, k_pad), lambda i: (0, 0)),    # -2 * E^T (resident)
                pl.BlockSpec((k_pad, d_pad), lambda i: (0, 0)),    # E (resident)
                pl.BlockSpec((1, k_pad), lambda i: (0, 0)),        # ||e||^2 (resident)
            ],
            out_specs=[
                pl.BlockSpec((tile_n, d_pad), lambda i: (i, 0)),
                pl.BlockSpec((1, tile_n), lambda i: (i, 0)),
                pl.BlockSpec((1, d_pad), lambda i: (i, 0)),
            ],
        ),
        compiler_params=pltpu.CompilerParams(
            dimension_semantics=("parallel",),       # disjoint output blocks per tile
            vmem_limit_bytes=vmem_limit,
        ),
    )(flat_p, et_m2, e_p, e2)

    quantized = q_pad[:N, :D].reshape(input_shape)
    indices = idx_pad.reshape(-1)[:N][:, None]                 # (N, 1) int32
    loss = jnp.sum(loss_parts) * scale
    # straight-through: forward value of `inputs + (quantized - inputs).detach()` == quantized
    # TODO(synk): straight-through gradient (detach) semantics are an autodiff concern,
    # not representable in a forward-only kernel.
    return quantized, loss, indices


if __name__ == "__main__":
    key = jax.random.PRNGKey(0)
    k_in, k_emb = jax.random.split(key)

    # small shapes consistent with the module
    B, H, W = 2, 4, 4
    D = 16            # embedding_dim
    K = 32            # num_embeddings
    commitment_cost = 0.25

    inputs = jax.random.normal(k_in, (B, H, W, D), dtype=jnp.float32)
    # nn.Embedding weight init: uniform(-1/K, 1/K), deterministic via PRNGKey(0)
    embeddings = jax.random.uniform(
        k_emb, (K, D), dtype=jnp.float32, minval=-1.0 / K, maxval=1.0 / K
    )

    quantized, loss, indices = vector_quantizer(inputs, embeddings, commitment_cost)
    jax.block_until_ready((quantized, loss, indices))

    # pure-JAX reference check (mirrors the PyTorch forward math)
    flat = inputs.reshape(-1, D)
    dist_ref = jnp.sum((flat[:, None, :] - embeddings[None, :, :]) ** 2, axis=2)
    idx_ref = jnp.argmin(dist_ref, axis=1)
    q_ref = embeddings[idx_ref].reshape(inputs.shape)
    loss_ref = (1.0 + commitment_cost) * jnp.mean((q_ref - inputs) ** 2)

    np.testing.assert_allclose(np.asarray(quantized), np.asarray(q_ref), rtol=1e-5, atol=1e-5)
    np.testing.assert_array_equal(np.asarray(indices[:, 0]), np.asarray(idx_ref))
    np.testing.assert_allclose(float(loss), float(loss_ref), rtol=1e-5, atol=1e-6)

    print("KERNEL_OK")
</pallas_src>

<mosaic_0001>
module attributes {stable_mosaic.version = 11 : i64} {
  func.func @_vq_kernel(%arg0: i32, %arg1: memref<256x128xf32, #tpu.memory_space<vmem>>, %arg2: memref<128x128xf32, #tpu.memory_space<vmem>>, %arg3: memref<128x128xf32, #tpu.memory_space<vmem>>, %arg4: memref<1x128xf32, #tpu.memory_space<vmem>>, %arg5: memref<256x128xf32, #tpu.memory_space<vmem>>, %arg6: memref<1x256xi32, #tpu.memory_space<vmem>>, %arg7: memref<1x128xf32, #tpu.memory_space<vmem>>) attributes {dimension_semantics = [#tpu.dimension_semantics<parallel>], iteration_bounds = array<i64: 1>, scalar_prefetch = 0 : i64, scratch_operands = 0 : i64, tpu.core_type = #tpu.core_type<tc>, window_params = [{transform_indices = @transform_0, window_bounds = array<i64: 256, 128>}, {pipeline_mode = #tpu.pipeline_mode<synchronous>, transform_indices = @transform_1, window_bounds = array<i64: 128, 128>}, {pipeline_mode = #tpu.pipeline_mode<synchronous>, transform_indices = @transform_2, window_bounds = array<i64: 128, 128>}, {pipeline_mode = #tpu.pipeline_mode<synchronous>, transform_indices = @transform_3, window_bounds = array<i64: 1, 128>}, {transform_indices = @transform_4, window_bounds = array<i64: 256, 128>}, {transform_indices = @transform_5, window_bounds = array<i64: 1, 256>}, {transform_indices = @transform_6, window_bounds = array<i64: 1, 128>}]} {
    %c0 = arith.constant 0 : index
    %c0_0 = arith.constant 0 : index
    %0 = vector.load %arg1[%c0, %c0_0] : memref<256x128xf32, #tpu.memory_space<vmem>>, vector<256x128xf32>
    %c0_1 = arith.constant 0 : index
    %c0_2 = arith.constant 0 : index
    %1 = vector.load %arg2[%c0_1, %c0_2] : memref<128x128xf32, #tpu.memory_space<vmem>>, vector<128x128xf32>
    %cst = arith.constant dense<0.000000e+00> : vector<256x128xf32>
    %2 = tpu.matmul %0, %1, %cst {dimension_numbers = #tpu.dot_dimension_numbers<[1], [0], [0], [1], [0, 0, 1, 1], [], []>} : vector<256x128xf32>, vector<128x128xf32>, vector<256x128xf32> -> vector<256x128xf32>
    %c0_3 = arith.constant 0 : index
    %c0_4 = arith.constant 0 : index
    %3 = vector.load %arg4[%c0_3, %c0_4] : memref<1x128xf32, #tpu.memory_space<vmem>>, vector<1x128xf32>
    %4 = vector.broadcast %3 : vector<1x128xf32> to vector<256x128xf32>
    %5 = arith.addf %2, %4 : vector<256x128xf32>
    %6 = tpu.iota {dimensions = array<i32: 1>} : vector<256x128xi32>
    %cst_5 = arith.constant dense<0x7F800000> : vector<256xf32>
    %7 = vector.multi_reduction <minimumf>, %5, %cst_5 [1] : vector<256x128xf32> to vector<256xf32>
    %8 = vector.shape_cast %7 : vector<256xf32> to vector<256x1xf32>
    %9 = vector.broadcast %8 : vector<256x1xf32> to vector<256x128xf32>
    %10 = arith.cmpf oeq, %5, %9 : vector<256x128xf32>
    %c128_i32 = arith.constant 128 : i32
    %11 = vector.broadcast %c128_i32 : i32 to vector<256x128xi32>
    %12 = arith.select %10, %6, %11 : vector<256x128xi1>, vector<256x128xi32>
    %cst_6 = arith.constant dense<2147483647> : vector<256xi32>
    %13 = vector.multi_reduction <minsi>, %12, %cst_6 [1] : vector<256x128xi32> to vector<256xi32>
    %14 = vector.shape_cast %13 : vector<256xi32> to vector<1x256xi32>
    %c0_7 = arith.constant 0 : index
    %c0_8 = arith.constant 0 : index
    %15 = vector.load %arg6[%c0_7, %c0_8] : memref<1x256xi32, #tpu.memory_space<vmem>>, vector<1x256xi32>
    tpu.vector_store %arg6[%c0_7, %c0_8], %14 {strides = array<i32>} : memref<1x256xi32, #tpu.memory_space<vmem>>, vector<1x256xi32>,
    %16 = vector.shape_cast %13 : vector<256xi32> to vector<256x1xi32>
    %17 = vector.broadcast %16 : vector<256x1xi32> to vector<256x128xi32>
    %18 = arith.cmpi eq, %6, %17 : vector<256x128xi32>
    %19 = arith.extui %18 : vector<256x128xi1> to vector<256x128xi32>
    %20 = arith.sitofp %19 : vector<256x128xi32> to vector<256x128xf32>
    %c0_9 = arith.constant 0 : index
    %c0_10 = arith.constant 0 : index
    %21 = vector.load %arg3[%c0_9, %c0_10] : memref<128x128xf32, #tpu.memory_space<vmem>>, vector<128x128xf32>
    %cst_11 = arith.constant dense<0.000000e+00> : vector<256x128xf32>
    %22 = tpu.matmul %20, %21, %cst_11 {dimension_numbers = #tpu.dot_dimension_numbers<[1], [0], [0], [1], [0, 0, 1, 1], [], []>} : vector<256x128xf32>, vector<128x128xf32>, vector<256x128xf32> -> vector<256x128xf32>
    %c0_12 = arith.constant 0 : index
    %c0_13 = arith.constant 0 : index
    %23 = vector.load %arg5[%c0_12, %c0_13] : memref<256x128xf32, #tpu.memory_space<vmem>>, vector<256x128xf32>
    tpu.vector_store %arg5[%c0_12, %c0_13], %22 {strides = array<i32>} : memref<256x128xf32, #tpu.memory_space<vmem>>, vector<256x128xf32>,
    %24 = arith.subf %22, %0 : vector<256x128xf32>
    %25 = tpu.iota {dimensions = array<i32: 0>} : vector<256x1xi32>
    %c256_i32 = arith.constant 256 : i32
    %26 = arith.muli %arg0, %c256_i32 : i32
    %27 = vector.broadcast %26 : i32 to vector<256x1xi32>
    %28 = arith.addi %25, %27 : vector<256x1xi32>
    %c32_i32 = arith.constant 32 : i32
    %29 = vector.broadcast %c32_i32 : i32 to vector<256x1xi32>
    %30 = arith.cmpi slt, %28, %29 : vector<256x1xi32>
    %cst_14 = arith.constant 0.000000e+00 : f32
    %31 = vector.shape_cast %30 : vector<256x1xi1> to vector<256x1xi1>
    %32 = vector.broadcast %31 : vector<256x1xi1> to vector<256x128xi1>
    %33 = vector.broadcast %cst_14 : f32 to vector<256x128xf32>
    %34 = arith.select %32, %24, %33 : vector<256x128xi1>, vector<256x128xf32>
    %35 = arith.mulf %34, %34 : vector<256x128xf32>
    %cst_15 = arith.constant dense<0.000000e+00> : vector<128xf32>
    %36 = vector.multi_reduction <add>, %35, %cst_15 [0] : vector<256x128xf32> to vector<128xf32>
    %37 = vector.shape_cast %36 : vector<128xf32> to vector<1x128xf32>
    %c0_16 = arith.constant 0 : index
    %c0_17 = arith.constant 0 : index
    %38 = vector.load %arg7[%c0_16, %c0_17] : memref<1x128xf32, #tpu.memory_space<vmem>>, vector<1x128xf32>
    tpu.vector_store %arg7[%c0_16, %c0_17], %37 {strides = array<i32>} : memref<1x128xf32, #tpu.memory_space<vmem>>, vector<1x128xf32>,
    return
  }
  func.func @transform_0(%arg0: i32) -> (i32, i32) {
    %c0_i32 = arith.constant 0 : i32
    %c0_i32_0 = arith.constant 0 : i32
    return %arg0, %c0_i32 : i32, i32
  }
  func.func @transform_1(%arg0: i32) -> (i32, i32) {
    %c0_i32 = arith.constant 0 : i32
    %c0_i32_0 = arith.constant 0 : i32
    %c0_i32_1 = arith.constant 0 : i32
    return %c0_i32, %c0_i32_0 : i32, i32
  }
  func.func @transform_2(%arg0: i32) -> (i32, i32) {
    %c0_i32 = arith.constant 0 : i32
    %c0_i32_0 = arith.constant 0 : i32
    %c0_i32_1 = arith.constant 0 : i32
    return %c0_i32, %c0_i32_0 : i32, i32
  }
  func.func @transform_3(%arg0: i32) -> (i32, i32) {
    %c0_i32 = arith.constant 0 : i32
    %c0_i32_0 = arith.constant 0 : i32
    %c0_i32_1 = arith.constant 0 : i32
    return %c0_i32, %c0_i32_0 : i32, i32
  }
  func.func @transform_4(%arg0: i32) -> (i32, i32) {
    %c0_i32 = arith.constant 0 : i32
    %c0_i32_0 = arith.constant 0 : i32
    return %arg0, %c0_i32 : i32, i32
  }
  func.func @transform_5(%arg0: i32) -> (i32, i32) {
    %c0_i32 = arith.constant 0 : i32
    %c0_i32_0 = arith.constant 0 : i32
    return %arg0, %c0_i32 : i32, i32
  }
  func.func @transform_6(%arg0: i32) -> (i32, i32) {
    %c0_i32 = arith.constant 0 : i32
    %c0_i32_0 = arith.constant 0 : i32
    return %arg0, %c0_i32 : i32, i32
  }
}

</mosaic_0001>

<bundles_post_ra>
// kernel: tpu_custom_call.1
= control target key start
LH: loop header
LB: loop body
LE: loop exit
PB: predicated region body
PF: predicated region fallthrough
CT: control target
= control target key end

     0   :  { %12 = vsyncpa [#allocation3], 0  ;;  %s6728_s0 = inlined_call_operand.hbm [shape: f32[256,128], index: 0, kind: input, shape index: {}]   ;;  %s6729_s1 = inlined_call_operand.hbm [shape: f32[128,128], index: 1, kind: input, shape index: {}]   ;;  %s6730_s2 = inlined_call_operand.hbm [shape: f32[128,128], index: 2, kind: input, shape index: {}]   ;;  %s6731_s3 = inlined_call_operand.vmem [shape: f32[1,128], index: 3, kind: input, shape index: {}]   ;;  %s6732_s4 = inlined_call_operand.hbm [shape: f32[256,128], index: 4, kind: output, shape index: {0}]   ;;  %s6733_s5 = inlined_call_operand.hbm [shape: s32[1,256], index: 5, kind: output, shape index: {1}]   ;;  %s6734_s6 = inlined_call_operand.hbm [shape: f32[1,128], index: 6, kind: output, shape index: {2}]  }
   0x1   :  { %13 = vsyncpa [#allocation6], 0 }
   0x2   :  { %14 = vsyncpa [#allocation4], 0 }
   0x3   :  { %15 = vsyncpa [#allocation10], 0  ;;  %s4994_s21 = smov [#allocation5]   ;;  %s4995_s23 = smov [#allocation2]  }
   0x4   :  { %s33_s22 = sshll.u32 %s4994_s21, 4  ;;  %s21_s24 = sshll.u32 %s4995_s23, 4  ;;  %s34_s22 = int_to_ptr.vmem [resolvable:$true] %s33_s22  ;;  %s22_s24 = int_to_ptr.vmem [resolvable:$true] %s21_s24 }
   0x5   :  { %s4874_s25 = scalar_lea.vmem %s34_s22, 2048  ;;  %p4879_p1 = scmp.lt.s32.totalorder %s34_s22, %s34_s22 }
   0x6   :  { %p4875_p0 = scmp.ne.s32.totalorder %s34_s22, %s4874_s25  ;;  %p4880_p2 = scmp.lt.s32.totalorder %s4874_s25, %s4874_s25 }
   0x8   :  { %p4881_p3 = por %p4880_p2, %p4879_p1 }
   0xa   :  { %p4882_p4 = pnand %p4881_p3, %p4875_p0 }
   0xc   :  { %4885 = shalt.err (!%p4882_p4)
}
   0xd   :  { %s4996_s26 = smov 128   ;;  %s4997_s27 = smov 8  }
   0xe   :  { %39 = dma.hbm_to_vmem [thread:$0]  %s6729_s1, 2048, %s34_s22, [#allocation6], %s4996_s26, %s4996_s26, %s4997_s27  }
   0xf   :  { %s4894_s30 = scalar_lea.vmem %s22_s24, 4096  ;;  %p4899_p6 = scmp.lt.s32.totalorder %s22_s24, %s22_s24 }
  0x10   :  { %p4895_p5 = scmp.ne.s32.totalorder %s22_s24, %s4894_s30  ;;  %p4900_p7 = scmp.lt.s32.totalorder %s4894_s30, %s4894_s30 }
  0x12   :  { %p4901_p8 = por %p4900_p7, %p4899_p6 }
  0x14   :  { %p4902_p9 = pnand %p4901_p8, %p4895_p5 }
  0x16   :  { %4905 = shalt.err (!%p4902_p9)
}
  0x17   :  { %27 = dma.hbm_to_vmem [thread:$0]  %s6728_s0, 4096, %s22_s24, [#allocation3], %s4996_s26, %s4996_s26, %s4997_s27  }
  0x18   :  { %s4998_s9 = smov [#allocation7]  }
  0x19   :  { %s45_s10 = sshll.u32 %s4998_s9, 4  ;;  %s46_s10 = int_to_ptr.vmem [resolvable:$true] %s45_s10 }
  0x1a   :  { %s4914_s11 = scalar_lea.vmem %s46_s10, 2048  ;;  %p4919_p11 = scmp.lt.s32.totalorder %s46_s10, %s46_s10 }
  0x1b   :  { %p4915_p10 = scmp.ne.s32.totalorder %s46_s10, %s4914_s11  ;;  %p4920_p12 = scmp.lt.s32.totalorder %s4914_s11, %s4914_s11 }
  0x1d   :  { %p4921_p13 = por %p4920_p12, %p4919_p11 }
  0x1f   :  { %p4922_p0 = pnand %p4921_p13, %p4915_p10 }
  0x21   :  { %4925 = shalt.err (!%p4922_p0)
}
  0x22   :  { %51 = dma.hbm_to_vmem [thread:$0]  %s6730_s2, 2048, %s46_s10, [#allocation6], %s4996_s26, %s4996_s26, %s4997_s27  }
  0x23   :  { %4986 = dma.done.wait [#allocation3], 4096  }
  0x24   :  { %4987 = vsyncadd [#allocation3], 4294963200 }
  0x25   :  { %4988 = dma.done.wait [#allocation6], 4096  }
  0x26   :  { %4989 = vsyncadd [#allocation6], 4294963200  ;;  %v110_v0 = vld [vmem:[#allocation5 + $0x78] sm:$0xff]  ;;  %v109_v1 = vld [vmem:[#allocation5 + $0x70] sm:$0xff] }
  0x27   :  { %4689 = vmatprep.subr.mxu0 %v110_v0  ;;  %v108_v2 = vld [vmem:[#allocation5 + $0x68] sm:$0xff]  ;;  %v107_v3 = vld [vmem:[#allocation5 + $0x60] sm:$0xff]  ;;  %v106_v5 = vld [vmem:[#allocation5 + $0x58] sm:$0xff] }
  0x28   :  { %4690 = vmatpush3.msra.mxu0 %v110_v0  ;;  %v63_v4 = vld [vmem:[#allocation2] sm:$0xff]  ;;  %v105_v6 = vld [vmem:[#allocation5 + $0x50] sm:$0xff]  ;;  %v104_v7 = vld [vmem:[#allocation5 + $0x48] sm:$0xff] }
  0x29   :  { %4691 = vmatprep.subr.mxu0 %v109_v1  ;;  %4721 = vmatprep.mubr.f32.mxu0 %v63_v4  ;;  %v103_v8 = vld [vmem:[#allocation5 + $0x40] sm:$0xff]  ;;  %v102_v9 = vld [vmem:[#allocation5 + $0x38] sm:$0xff]  ;;  %v101_v10 = vld [vmem:[#allocation5 + $0x30] sm:$0xff] }
  0x2a   :  { %4692 = vmatpush3.msra.mxu0 %v109_v1  ;;  %v100_v11 = vld [vmem:[#allocation5 + $0x28] sm:$0xff]  ;;  %v99_v12 = vld [vmem:[#allocation5 + $0x20] sm:$0xff]  ;;  %v98_v13 = vld [vmem:[#allocation5 + $0x18] sm:$0xff] }
  0x2b   :  { %4693 = vmatprep.subr.mxu0 %v108_v2  ;;  %v97_v14 = vld [vmem:[#allocation5 + $0x10] sm:$0xff]  ;;  %v96_v15 = vld [vmem:[#allocation5 + $0x8] sm:$0xff]  ;;  %v95_v16 = vld [vmem:[#allocation5] sm:$0xff] }
  0x2c   :  { %4694 = vmatpush3.msra.mxu0 %v108_v2  ;;  %v64_v17 = vld [vmem:[#allocation2 + $0x8] sm:$0xff]  ;;  %v65_v18 = vld [vmem:[#allocation2 + $0x10] sm:$0xff]  ;;  %v66_v19 = vld [vmem:[#allocation2 + $0x18] sm:$0xff] }
  0x2d   :  { %4695 = vmatprep.subr.mxu0 %v107_v3  ;;  %v67_v20 = vld [vmem:[#allocation2 + $0x20] sm:$0xff]  ;;  %v68_v21 = vld [vmem:[#allocation2 + $0x28] sm:$0xff]  ;;  %v69_v22 = vld [vmem:[#allocation2 + $0x30] sm:$0xff] }
  0x2e   :  { %4696 = vmatpush3.msra.mxu0 %v107_v3  ;;  %v70_v23 = vld [vmem:[#allocation2 + $0x38] sm:$0xff]  ;;  %v71_v24 = vld [vmem:[#allocation2 + $0x40] sm:$0xff]  ;;  %v72_v25 = vld [vmem:[#allocation2 + $0x48] sm:$0xff] }
  0x2f   :  { %4697 = vmatprep.subr.mxu0 %v106_v5  ;;  %v73_v26 = vld [vmem:[#allocation2 + $0x50] sm:$0xff]  ;;  %v74_v27 = vld [vmem:[#allocation2 + $0x58] sm:$0xff]  ;;  %v75_v28 = vld [vmem:[#allocation2 + $0x60] sm:$0xff] }
  0x30   :  { %4698 = vmatpush3.msra.mxu0 %v106_v5  ;;  %v76_v29 = vld [vmem:[#allocation2 + $0x68] sm:$0xff]  ;;  %v77_v30 = vld [vmem:[#allocation2 + $0x70] sm:$0xff]  ;;  %v78_v31 = vld [vmem:[#allocation2 + $0x78] sm:$0xff] }
  0x31   :  { %4699 = vmatprep.subr.mxu0 %v105_v6  ;;  %v79_v32 = vld [vmem:[#allocation2 + $0x80] sm:$0xff]  ;;  %v80_v33 = vld [vmem:[#allocation2 + $0x88] sm:$0xff]  ;;  %v81_v34 = vld [vmem:[#allocation2 + $0x90] sm:$0xff] }
  0x32   :  { %4700 = vmatpush3.msra.mxu0 %v105_v6  ;;  %v82_v35 = vld [vmem:[#allocation2 + $0x98] sm:$0xff]  ;;  %v83_v36 = vld [vmem:[#allocation2 + $0xa0] sm:$0xff]  ;;  %v84_v37 = vld [vmem:[#allocation2 + $0xa8] sm:$0xff] }
  0x33   :  { %4701 = vmatprep.subr.mxu0 %v104_v7  ;;  %v85_v38 = vld [vmem:[#allocation2 + $0xb0] sm:$0xff]  ;;  %v86_v39 = vld [vmem:[#allocation2 + $0xb8] sm:$0xff]  ;;  %v87_v40 = vld [vmem:[#allocation2 + $0xc0] sm:$0xff] }
  0x34   :  { %4702 = vmatpush3.msra.mxu0 %v104_v7  ;;  %v88_v41 = vld [vmem:[#allocation2 + $0xc8] sm:$0xff]  ;;  %v89_v42 = vld [vmem:[#allocation2 + $0xd0] sm:$0xff]  ;;  %v90_v43 = vld [vmem:[#allocation2 + $0xd8] sm:$0xff] }
  0x35   :  { %4703 = vmatprep.subr.mxu0 %v103_v8  ;;  %v91_v44 = vld [vmem:[#allocation2 + $0xe0] sm:$0xff]  ;;  %v92_v45 = vld [vmem:[#allocation2 + $0xe8] sm:$0xff]  ;;  %v93_v46 = vld [vmem:[#allocation2 + $0xf0] sm:$0xff] }
  0x36   :  { %4704 = vmatpush3.msra.mxu0 %v103_v8  ;;  %v94_v47 = vld [vmem:[#allocation2 + $0xf8] sm:$0xff]  ;;  %v5061_v49 = vld [vmem:[%s6731_s3] ss:$0 sm:$0xff]  ;;  %s5002_s3 = smov [#allocation8]  }
  0x37   :  { %4705 = vmatprep.subr.mxu0 %v102_v9  ;;  %s4488_s13 = sshll.u32 %s5002_s3, 4  ;;  %s4489_s13 = int_to_ptr.vmem [resolvable:$true] %s4488_s13 }
  0x38   :  { %4706 = vmatpush3.msra.mxu0 %v102_v9  ;;  %s4926_s14 = scalar_lea.vmem %s4489_s13, 4096  ;;  %p4931_p2 = scmp.lt.s32.totalorder %s4489_s13, %s4489_s13 }
  0x39   :  { %4707 = vmatprep.subr.mxu0 %v101_v10  ;;  %p4927_p1 = scmp.ne.s32.totalorder %s4489_s13, %s4926_s14  ;;  %p4932_p3 = scmp.lt.s32.totalorder %s4926_s14, %s4926_s14 }
  0x3a   :  { %4708 = vmatpush3.msra.mxu0 %v101_v10 }
  0x3b   :  { %4709 = vmatprep.subr.mxu0 %v100_v11  ;;  %p4933_p4 = por %p4932_p3, %p4931_p2 }
  0x3c   :  { %4710 = vmatpush3.msra.mxu0 %v100_v11 }
  0x3d   :  { %4711 = vmatprep.subr.mxu0 %v99_v12  ;;  %p4934_p5 = pnand %p4933_p4, %p4927_p1 }
  0x3e   :  { %4712 = vmatpush3.msra.mxu0 %v99_v12 }
  0x3f   :  { %4713 = vmatprep.subr.mxu0 %v98_v13 }
  0x40   :  { %4714 = vmatpush3.msra.mxu0 %v98_v13 }
  0x41   :  { %4715 = vmatprep.subr.mxu0 %v97_v14 }
  0x42   :  { %4716 = vmatpush3.msra.mxu0 %v97_v14 }
  0x43   :  { %4717 = vmatprep.subr.mxu0 %v96_v15 }
  0x44   :  { %4718 = vmatpush3.msra.mxu0 %v96_v15 }
  0x45   :  { %4719 = vmatprep.subr.mxu0 %v95_v16 }
  0x46   :  { %4720 = vmatpush3.msra.mxu0 %v95_v16 }
  0x47   :  { %4722 = vmatmul.mubr.f32.vlgmr.msra.gmra.mxu0 %v64_v17 }
  0x48   :  { %4724 = vmatprep.mubr.f32.mxu0 %v65_v18 }
  0x4b   :  { %4725 = vmatmul.mubr.f32.gmra.mxu0 %v66_v19 }
  0x4c   :  { %4727 = vmatprep.mubr.f32.mxu0 %v67_v20 }
  0x4f   :  { %4728 = vmatmul.mubr.f32.gmra.mxu0 %v68_v21 }
  0x50   :  { %4730 = vmatprep.mubr.f32.mxu0 %v69_v22 }
  0x53   :  { %4731 = vmatmul.mubr.f32.gmra.mxu0 %v70_v23 }
  0x54   :  { %4733 = vmatprep.mubr.f32.mxu0 %v71_v24 }
  0x57   :  { %4734 = vmatmul.mubr.f32.gmra.mxu0 %v72_v25 }
  0x58   :  { %4736 = vmatprep.mubr.f32.mxu0 %v73_v26 }
  0x5b   :  { %4737 = vmatmul.mubr.f32.gmra.mxu0 %v74_v27 }
  0x5c   :  { %4739 = vmatprep.mubr.f32.mxu0 %v75_v28 }
  0x5f   :  { %4740 = vmatmul.mubr.f32.gmra.mxu0 %v76_v29 }
  0x60   :  { %4742 = vmatprep.mubr.f32.mxu0 %v77_v30 }
  0x63   :  { %4743 = vmatmul.mubr.f32.gmra.mxu0 %v78_v31 }
  0x64   :  { %4745 = vmatprep.mubr.f32.mxu0 %v79_v32 }
  0x67   :  { %4746 = vmatmul.mubr.f32.gmra.mxu0 %v80_v33 }
  0x68   :  { %4748 = vmatprep.mubr.f32.mxu0 %v81_v34 }
  0x6b   :  { %4749 = vmatmul.mubr.f32.gmra.mxu0 %v82_v35 }
  0x6c   :  { %4751 = vmatprep.mubr.f32.mxu0 %v83_v36 }
  0x6f   :  { %4752 = vmatmul.mubr.f32.gmra.mxu0 %v84_v37 }
  0x70   :  { %4754 = vmatprep.mubr.f32.mxu0 %v85_v38 }
  0x73   :  { %4755 = vmatmul.mubr.f32.gmra.mxu0 %v86_v39 }
  0x74   :  { %4757 = vmatprep.mubr.f32.mxu0 %v87_v40 }
  0x77   :  { %4758 = vmatmul.mubr.f32.gmra.mxu0 %v88_v41 }
  0x78   :  { %4760 = vmatprep.mubr.f32.mxu0 %v89_v42 }
  0x7b   :  { %4761 = vmatmul.mubr.f32.gmra.mxu0 %v90_v43 }
  0x7c   :  { %4763 = vmatprep.mubr.f32.mxu0 %v91_v44 }
  0x7f   :  { %4764 = vmatmul.mubr.f32.gmra.mxu0 %v92_v45 }
  0x80   :  { %4766 = vmatprep.mubr.f32.mxu0 %v93_v46 }
  0x83   :  { %4767 = vmatmul.mubr.f32.gmra.mxu0 %v94_v47 }
 0x107   :  { %v4723_v48 = vpop.f32.mrf.mxu0 }
 0x108   :  { %v5068_v54 = vadd.f32 %v4723_v48, %v5061_v49 }
 0x109   :  { %v184_v50 = vpop.f32.mrf.mxu0 }
 0x10a   :  { %v5064_v51 = vadd.f32 %v5061_v49, %v184_v50  ;;  %v6735_v50 = vlaneseq }
 0x10b   :  { %v4726_v52 = vpop.f32.mrf.mxu0 }
 0x10c   :  { %345 = vmin.xlane.f32.xlu0 %v5064_v51  ;;  %v5076_v58 = vadd.f32 %v4726_v52, %v5061_v49  ;;  %v5192_v52 = vand.u32 127, %v6735_v50 }
 0x10d   :  { %v194_v53 = vpop.f32.mrf.mxu0 }
 0x10e   :  { %v5071_v55 = vadd.f32 %v5061_v49, %v194_v53  ;;  %6750 = vst [vmem:[#allocation16_spill] sm:$0xff] %v5192_v52 }
 0x10f   :  { %v4729_v56 = vpop.f32.mrf.mxu0 }
 0x110   :  { %349 = vmin.xlane.f32.xlu1 %v5071_v55  ;;  %347 = vmin.xlane.f32.xlu0 %v5068_v54  ;;  %v5084_v62 = vadd.f32 %v4729_v56, %v5061_v49 }
 0x111   :  { %v204_v57 = vpop.f32.mrf.mxu0 }
 0x112   :  { %v5079_v59 = vadd.f32 %v5061_v49, %v204_v57 }
 0x113   :  { %v4732_v60 = vpop.f32.mrf.mxu0 }
 0x114   :  { %351 = vmin.xlane.f32.xlu1 %v5076_v58  ;;  %353 = vmin.xlane.f32.xlu0 %v5079_v59  ;;  %v5092_v2 = vadd.f32 %v4732_v60, %v5061_v49 }
 0x115   :  { %v214_v61 = vpop.f32.mrf.mxu0 }
 0x116   :  { %v5087_v63 = vadd.f32 %v5061_v49, %v214_v61 }
 0x117   :  { %v4735_v0 = vpop.f32.mrf.mxu0 }
 0x118   :  { %355 = vmin.xlane.f32.xlu1 %v5084_v62  ;;  %357 = vmin.xlane.f32.xlu0 %v5087_v63  ;;  %v5100_v6 = vadd.f32 %v4735_v0, %v5061_v49 }
 0x119   :  { %v224_v1 = vpop.f32.mrf.mxu0 }
 0x11a   :  { %v5095_v3 = vadd.f32 %v5061_v49, %v224_v1 }
 0x11b   :  { %v4738_v4 = vpop.f32.mrf.mxu0 }
 0x11c   :  { %359 = vmin.xlane.f32.xlu1 %v5092_v2  ;;  %361 = vmin.xlane.f32.xlu0 %v5095_v3  ;;  %v5108_v10 = vadd.f32 %v4738_v4, %v5061_v49 }
 0x11d   :  { %v234_v5 = vpop.f32.mrf.mxu0 }
 0x11e   :  { %v5103_v7 = vadd.f32 %v5061_v49, %v234_v5 }
 0x11f   :  { %v4741_v8 = vpop.f32.mrf.mxu0 }
 0x120   :  { %363 = vmin.xlane.f32.xlu1 %v5100_v6  ;;  %365 = vmin.xlane.f32.xlu0 %v5103_v7  ;;  %v5116_v14 = vadd.f32 %v4741_v8, %v5061_v49 }
 0x121   :  { %v244_v9 = vpop.f32.mrf.mxu0 }
 0x122   :  { %v5111_v11 = vadd.f32 %v5061_v49, %v244_v9 }
 0x123   :  { %v4744_v12 = vpop.f32.mrf.mxu0 }
 0x124   :  { %367 = vmin.xlane.f32.xlu1 %v5108_v10  ;;  %369 = vmin.xlane.f32.xlu0 %v5111_v11  ;;  %v5124_v18 = vadd.f32 %v4744_v12, %v5061_v49 }
 0x125   :  { %v254_v13 = vpop.f32.mrf.mxu0 }
 0x126   :  { %v5119_v15 = vadd.f32 %v5061_v49, %v254_v13 }
 0x127   :  { %v4747_v16 = vpop.f32.mrf.mxu0 }
 0x128   :  { %371 = vmin.xlane.f32.xlu1 %v5116_v14  ;;  %373 = vmin.xlane.f32.xlu0 %v5119_v15  ;;  %v5132_v22 = vadd.f32 %v4747_v16, %v5061_v49 }
 0x129   :  { %v264_v17 = vpop.f32.mrf.mxu0 }
 0x12a   :  { %v5127_v19 = vadd.f32 %v5061_v49, %v264_v17 }
 0x12b   :  { %v4750_v20 = vpop.f32.mrf.mxu0 }
 0x12c   :  { %375 = vmin.xlane.f32.xlu1 %v5124_v18  ;;  %377 = vmin.xlane.f32.xlu0 %v5127_v19  ;;  %v5140_v26 = vadd.f32 %v4750_v20, %v5061_v49 }
 0x12d   :  { %v274_v21 = vpop.f32.mrf.mxu0 }
 0x12e   :  { %v5135_v23 = vadd.f32 %v5061_v49, %v274_v21 }
 0x12f   :  { %v4753_v24 = vpop.f32.mrf.mxu0 }
 0x130   :  { %379 = vmin.xlane.f32.xlu1 %v5132_v22  ;;  %381 = vmin.xlane.f32.xlu0 %v5135_v23  ;;  %v5148_v30 = vadd.f32 %v4753_v24, %v5061_v49 }
 0x131   :  { %v284_v25 = vpop.f32.mrf.mxu0 }
 0x132   :  { %v5143_v27 = vadd.f32 %v5061_v49, %v284_v25 }
 0x133   :  { %v4756_v28 = vpop.f32.mrf.mxu0 }
 0x134   :  { %383 = vmin.xlane.f32.xlu1 %v5140_v26  ;;  %385 = vmin.xlane.f32.xlu0 %v5143_v27  ;;  %v5156_v34 = vadd.f32 %v4756_v28, %v5061_v49 }
 0x135   :  { %v294_v29 = vpop.f32.mrf.mxu0 }
 0x136   :  { %v5151_v31 = vadd.f32 %v5061_v49, %v294_v29 }
 0x137   :  { %v4759_v32 = vpop.f32.mrf.mxu0 }
 0x138   :  { %387 = vmin.xlane.f32.xlu1 %v5148_v30  ;;  %389 = vmin.xlane.f32.xlu0 %v5151_v31  ;;  %v5164_v38 = vadd.f32 %v4759_v32, %v5061_v49 }
 0x139   :  { %v304_v33 = vpop.f32.mrf.mxu0 }
 0x13a   :  { %v5159_v35 = vadd.f32 %v5061_v49, %v304_v33 }
 0x13b   :  { %v4762_v36 = vpop.f32.mrf.mxu0 }
 0x13c   :  { %391 = vmin.xlane.f32.xlu1 %v5156_v34  ;;  %393 = vmin.xlane.f32.xlu0 %v5159_v35  ;;  %v5172_v42 = vadd.f32 %v4762_v36, %v5061_v49 }
 0x13d   :  { %v314_v37 = vpop.f32.mrf.mxu0 }
 0x13e   :  { %v5167_v39 = vadd.f32 %v5061_v49, %v314_v37 }
 0x13f   :  { %v4765_v40 = vpop.f32.mrf.mxu0 }
 0x140   :  { %395 = vmin.xlane.f32.xlu1 %v5164_v38  ;;  %397 = vmin.xlane.f32.xlu0 %v5167_v39  ;;  %v5180_v46 = vadd.f32 %v4765_v40, %v5061_v49 }
 0x141   :  { %v324_v41 = vpop.f32.mrf.mxu0 }
 0x142   :  { %v5175_v43 = vadd.f32 %v5061_v49, %v324_v41 }
 0x143   :  { %v4768_v44 = vpop.f32.mrf.mxu0 }
 0x144   :  { %399 = vmin.xlane.f32.xlu1 %v5172_v42  ;;  %401 = vmin.xlane.f32.xlu0 %v5175_v43  ;;  %v5188_v48 = vadd.f32 %v4768_v44, %v5061_v49 }
 0x145   :  { %v334_v45 = vpop.f32.mrf.mxu0 }
 0x146   :  { %v5183_v47 = vadd.f32 %v5061_v49, %v334_v45 }
 0x148   :  { %403 = vmin.xlane.f32.xlu1 %v5180_v46  ;;  %405 = vmin.xlane.f32.xlu0 %v5183_v47 }
 0x14c   :  { %407 = vmin.xlane.f32.xlu1 %v5188_v48 }
 0x195   :  { %v346_v53 = vpop.xlane.xlu0 %345 }
 0x196   :  { %vm409_vm0 = vcmp.eq.f32.partialorder %v5064_v51, %v346_v53 }
 0x197   :  { %v5196_v56 = vsel %vm409_vm0, %v5192_v52, 128 }
 0x198   :  { %v474_v57 = vshra.s32 %v5196_v56, 16 }
 0x199   :  { %v350_v60 = vpop.xlane.xlu1 %349  ;;  %v348_v61 = vpop.xlane.xlu0 %347 }
 0x19a   :  { %vm411_vm1 = vcmp.eq.f32.partialorder %v5071_v55, %v350_v60  ;;  %vm410_vm2 = vcmp.eq.f32.partialorder %v5068_v54, %v348_v61  ;;  %v5201_v49 = vcvt.s32.f32 %v474_v57 }
 0x19b   :  { %v5204_v0 = vsel %vm411_vm1, %v5192_v52, 128  ;;  %v5207_v1 = vsel %vm410_vm2, %v5192_v52, 128 }
 0x19c   :  { %477 = vmin.xlane.f32.xlu0 %v5201_v49  ;;  %v502_v51 = vshra.s32 %v5204_v0, 16  ;;  %v488_v4 = vshra.s32 %v5207_v1, 16 }
 0x19d   :  { %v352_v5 = vpop.xlane.xlu1 %351  ;;  %v354_v8 = vpop.xlane.xlu0 %353 }
 0x19e   :  { %vm412_vm3 = vcmp.eq.f32.partialorder %v5076_v58, %v352_v5  ;;  %vm413_vm4 = vcmp.eq.f32.partialorder %v5079_v59, %v354_v8  ;;  %v5214_v54 = vcvt.s32.f32 %v502_v51  ;;  %v5216_v55 = vcvt.s32.f32 %v488_v4 }
 0x19f   :  { %v5219_v9 = vsel %vm412_vm3, %v5192_v52, 128  ;;  %v5222_v12 = vsel %vm413_vm4, %v5192_v52, 128 }
 0x1a0   :  { %505 = vmin.xlane.f32.xlu0 %v5214_v54  ;;  %491 = vmin.xlane.f32.xlu1 %v5216_v55  ;;  %v516_v13 = vshra.s32 %v5219_v9, 16  ;;  %v530_v58 = vshra.s32 %v5222_v12, 16 }
 0x1a1   :  { %v356_v16 = vpop.xlane.xlu1 %355  ;;  %v358_v59 = vpop.xlane.xlu0 %357 }
 0x1a2   :  { %vm414_vm5 = vcmp.eq.f32.partialorder %v5084_v62, %v356_v16  ;;  %vm415_vm6 = vcmp.eq.f32.partialorder %v5087_v63, %v358_v59  ;;  %v5230_v17 = vcvt.s32.f32 %v516_v13  ;;  %v5232_v20 = vcvt.s32.f32 %v530_v58 }
 0x1a3   :  { %v5235_v21 = vsel %vm414_vm5, %v5192_v52, 128  ;;  %v5238_v24 = vsel %vm415_vm6, %v5192_v52, 128 }
 0x1a4   :  { %519 = vmin.xlane.f32.xlu1 %v5230_v17  ;;  %533 = vmin.xlane.f32.xlu0 %v5232_v20  ;;  %v544_v25 = vshra.s32 %v5235_v21, 16  ;;  %v558_v62 = vshra.s32 %v5238_v24, 16 }
 0x1a5   :  { %v360_v28 = vpop.xlane.xlu1 %359  ;;  %v362_v63 = vpop.xlane.xlu0 %361 }
 0x1a6   :  { %vm416_vm7 = vcmp.eq.f32.partialorder %v5092_v2, %v360_v28  ;;  %vm417_vm8 = vcmp.eq.f32.partialorder %v5095_v3, %v362_v63  ;;  %v5246_v29 = vcvt.s32.f32 %v544_v25  ;;  %v5248_v32 = vcvt.s32.f32 %v558_v62 }
 0x1a7   :  { %v5251_v33 = vsel %vm416_vm7, %v5192_v52, 128  ;;  %v5254_v36 = vsel %vm417_vm8, %v5192_v52, 128 }
 0x1a8   :  { %547 = vmin.xlane.f32.xlu1 %v5246_v29  ;;  %561 = vmin.xlane.f32.xlu0 %v5248_v32  ;;  %v572_v37 = vshra.s32 %v5251_v33, 16  ;;  %v586_v2 = vshra.s32 %v5254_v36, 16 }
 0x1a9   :  { %v364_v40 = vpop.xlane.xlu1 %363  ;;  %v366_v3 = vpop.xlane.xlu0 %365 }
 0x1aa   :  { %vm418_vm9 = vcmp.eq.f32.partialorder %v5100_v6, %v364_v40  ;;  %vm419_vm10 = vcmp.eq.f32.partialorder %v5103_v7, %v366_v3  ;;  %v5262_v41 = vcvt.s32.f32 %v572_v37  ;;  %v5264_v44 = vcvt.s32.f32 %v586_v2 }
 0x1ab   :  { %v5267_v45 = vsel %vm418_vm9, %v5192_v52, 128  ;;  %v5270_v53 = vsel %vm419_vm10, %v5192_v52, 128 }
 0x1ac   :  { %575 = vmin.xlane.f32.xlu1 %v5262_v41  ;;  %589 = vmin.xlane.f32.xlu0 %v5264_v44  ;;  %v600_v57 = vshra.s32 %v5267_v45, 16  ;;  %v614_v6 = vshra.s32 %v5270_v53, 16 }
 0x1ad   :  { %v368_v60 = vpop.xlane.xlu1 %367  ;;  %v370_v7 = vpop.xlane.xlu0 %369 }
 0x1ae   :  { %vm420_vm11 = vcmp.eq.f32.partialorder %v5108_v10, %v368_v60  ;;  %vm421_vm12 = vcmp.eq.f32.partialorder %v5111_v11, %v370_v7  ;;  %v5278_v61 = vcvt.s32.f32 %v600_v57  ;;  %v5280_v51 = vcvt.s32.f32 %v614_v6 }
 0x1af   :  { %v5283_v4 = vsel %vm420_vm11, %v5192_v52, 128  ;;  %v5286_v5 = vsel %vm421_vm12, %v5192_v52, 128 }
 0x1b0   :  { %603 = vmin.xlane.f32.xlu1 %v5278_v61  ;;  %617 = vmin.xlane.f32.xlu0 %v5280_v51  ;;  %v628_v8 = vshra.s32 %v5283_v4, 16  ;;  %v642_v10 = vshra.s32 %v5286_v5, 16 }
 0x1b1   :  { %v372_v13 = vpop.xlane.xlu1 %371  ;;  %v374_v11 = vpop.xlane.xlu0 %373 }
 0x1b2   :  { %vm422_vm13 = vcmp.eq.f32.partialorder %v5116_v14, %v372_v13  ;;  %vm423_vm14 = vcmp.eq.f32.partialorder %v5119_v15, %v374_v11  ;;  %v5294_v58 = vcvt.s32.f32 %v628_v8  ;;  %v5296_v16 = vcvt.s32.f32 %v642_v10 }
 0x1b3   :  { %v5299_v59 = vsel %vm422_vm13, %v5192_v52, 128  ;;  %v5302_v25 = vsel %vm423_vm14, %v5192_v52, 128 }
 0x1b4   :  { %631 = vmin.xlane.f32.xlu1 %v5294_v58  ;;  %645 = vmin.xlane.f32.xlu0 %v5296_v16  ;;  %v656_v62 = vshra.s32 %v5299_v59, 16  ;;  %v670_v14 = vshra.s32 %v5302_v25, 16 }
 0x1b5   :  { %v376_v28 = vpop.xlane.xlu1 %375  ;;  %v378_v15 = vpop.xlane.xlu0 %377 }
 0x1b6   :  { %vm424_vm15 = vcmp.eq.f32.partialorder %v5124_v18, %v376_v28  ;;  %vm425_vm0 = vcmp.eq.f32.partialorder %v5127_v19, %v378_v15  ;;  %v5310_v63 = vcvt.s32.f32 %v656_v62  ;;  %v5312_v37 = vcvt.s32.f32 %v670_v14 }
 0x1b7   :  { %v5315_v2 = vsel %vm424_vm15, %v5192_v52, 128  ;;  %v5318_v40 = vsel %vm425_vm0, %v5192_v52, 128 }
 0x1b8   :  { %659 = vmin.xlane.f32.xlu1 %v5310_v63  ;;  %673 = vmin.xlane.f32.xlu0 %v5312_v37  ;;  %v684_v3 = vshra.s32 %v5315_v2, 16  ;;  %v698_v18 = vshra.s32 %v5318_v40, 16 }
 0x1b9   :  { %v380_v57 = vpop.xlane.xlu1 %379  ;;  %v382_v19 = vpop.xlane.xlu0 %381 }
 0x1ba   :  { %vm426_vm1 = vcmp.eq.f32.partialorder %v5132_v22, %v380_v57  ;;  %vm427_vm2 = vcmp.eq.f32.partialorder %v5135_v23, %v382_v19  ;;  %v5326_v6 = vcvt.s32.f32 %v684_v3  ;;  %v5328_v60 = vcvt.s32.f32 %v698_v18 }
 0x1bb   :  { %v5331_v7 = vsel %vm426_vm1, %v5192_v52, 128  ;;  %v5334_v8 = vsel %vm427_vm2, %v5192_v52, 128 }
 0x1bc   :  { %687 = vmin.xlane.f32.xlu1 %v5326_v6  ;;  %701 = vmin.xlane.f32.xlu0 %v5328_v60  ;;  %v712_v10 = vshra.s32 %v5331_v7, 16  ;;  %v726_v22 = vshra.s32 %v5334_v8, 16 }
 0x1bd   :  { %v384_v13 = vpop.xlane.xlu1 %383  ;;  %v386_v23 = vpop.xlane.xlu0 %385 }
 0x1be   :  { %vm428_vm3 = vcmp.eq.f32.partialorder %v5140_v26, %v384_v13  ;;  %vm429_vm4 = vcmp.eq.f32.partialorder %v5143_v27, %v386_v23  ;;  %v5342_v11 = vcvt.s32.f32 %v712_v10  ;;  %v5344_v62 = vcvt.s32.f32 %v726_v22 }
 0x1bf   :  { %v5347_v14 = vsel %vm428_vm3, %v5192_v52, 128  ;;  %v5350_v28 = vsel %vm429_vm4, %v5192_v52, 128 }
 0x1c0   :  { %715 = vmin.xlane.f32.xlu1 %v5342_v11  ;;  %729 = vmin.xlane.f32.xlu0 %v5344_v62  ;;  %v740_v15 = vshra.s32 %v5347_v14, 16  ;;  %v754_v26 = vshra.s32 %v5350_v28, 16 }
 0x1c1   :  { %v388_v3 = vpop.xlane.xlu1 %387  ;;  %v390_v27 = vpop.xlane.xlu0 %389 }
 0x1c2   :  { %vm430_vm5 = vcmp.eq.f32.partialorder %v5148_v30, %v388_v3  ;;  %vm431_vm6 = vcmp.eq.f32.partialorder %v5151_v31, %v390_v27  ;;  %v5358_v18 = vcvt.s32.f32 %v740_v15  ;;  %v5360_v57 = vcvt.s32.f32 %v754_v26 }
 0x1c3   :  { %v5363_v19 = vsel %vm430_vm5, %v5192_v52, 128  ;;  %v5366_v10 = vsel %vm431_vm6, %v5192_v52, 128 }
 0x1c4   :  { %743 = vmin.xlane.f32.xlu1 %v5358_v18  ;;  %757 = vmin.xlane.f32.xlu0 %v5360_v57  ;;  %v768_v22 = vshra.s32 %v5363_v19, 16  ;;  %v782_v30 = vshra.s32 %v5366_v10, 16 }
 0x1c5   :  { %v392_v13 = vpop.xlane.xlu1 %391  ;;  %v394_v31 = vpop.xlane.xlu0 %393 }
 0x1c6   :  { %vm432_vm7 = vcmp.eq.f32.partialorder %v5156_v34, %v392_v13  ;;  %vm433_vm8 = vcmp.eq.f32.partialorder %v5159_v35, %v394_v31  ;;  %v5374_v23 = vcvt.s32.f32 %v768_v22  ;;  %v5376_v15 = vcvt.s32.f32 %v782_v30 }
 0x1c7   :  { %v5379_v26 = vsel %vm432_vm7, %v5192_v52, 128  ;;  %v5382_v3 = vsel %vm433_vm8, %v5192_v52, 128 }
 0x1c8   :  { %6751 = vst [vmem:[#allocation17_spill] sm:$0xff] %v5376_v15  ;;  %771 = vmin.xlane.f32.xlu1 %v5374_v23  ;;  %785 = vmin.xlane.f32.xlu0 %v5376_v15  ;;  %v796_v27 = vshra.s32 %v5379_v26, 16  ;;  %v810_v34 = vshra.s32 %v5382_v3, 16 }
 0x1c9   :  { %v396_v13 = vpop.xlane.xlu1 %395  ;;  %v398_v35 = vpop.xlane.xlu0 %397 }
 0x1ca   :  { %vm434_vm9 = vcmp.eq.f32.partialorder %v5164_v38, %v396_v13  ;;  %vm435_vm10 = vcmp.eq.f32.partialorder %v5167_v39, %v398_v35  ;;  %v5390_v22 = vcvt.s32.f32 %v796_v27  ;;  %v5392_v30 = vcvt.s32.f32 %v810_v34 }
 0x1cb   :  { %v5395_v31 = vsel %vm434_vm9, %v5192_v52, 128  ;;  %v5398_v50 = vsel %vm435_vm10, %v5192_v52, 128 }
 0x1cc   :  { %6752 = vst [vmem:[#allocation18_spill] sm:$0xff] %v5390_v22  ;;  %6753 = vst [vmem:[#allocation19_spill] sm:$0xff] %v5392_v30  ;;  %799 = vmin.xlane.f32.xlu1 %v5390_v22  ;;  %813 = vmin.xlane.f32.xlu0 %v5392_v30  ;;  %v824_v15 = vshra.s32 %v5395_v31, 16  ;;  %v838_v38 = vshra.s32 %v5398_v50, 16 }
 0x1cd   :  { %v400_v13 = vpop.xlane.xlu1 %399  ;;  %v402_v39 = vpop.xlane.xlu0 %401 }
 0x1ce   :  { %vm436_vm11 = vcmp.eq.f32.partialorder %v5172_v42, %v400_v13  ;;  %vm437_vm12 = vcmp.eq.f32.partialorder %v5175_v43, %v402_v39  ;;  %v5406_v27 = vcvt.s32.f32 %v824_v15  ;;  %v5408_v34 = vcvt.s32.f32 %v838_v38 }
 0x1cf   :  { %v5411_v35 = vsel %vm436_vm11, %v5192_v52, 128  ;;  %v5414_v22 = vsel %vm437_vm12, %v5192_v52, 128 }
 0x1d0   :  { %6754 = vst [vmem:[#allocation20_spill] sm:$0xff] %v5406_v27  ;;  %6755 = vst [vmem:[#allocation21_spill] sm:$0xff] %v5408_v34  ;;  %827 = vmin.xlane.f32.xlu1 %v5406_v27  ;;  %841 = vmin.xlane.f32.xlu0 %v5408_v34  ;;  %v852_v30 = vshra.s32 %v5411_v35, 16  ;;  %v866_v42 = vshra.s32 %v5414_v22, 16 }
 0x1d1   :  { %v404_v13 = vpop.xlane.xlu1 %403  ;;  %v406_v43 = vpop.xlane.xlu0 %405 }
 0x1d2   :  { %vm438_vm13 = vcmp.eq.f32.partialorder %v5180_v46, %v404_v13  ;;  %vm439_vm14 = vcmp.eq.f32.partialorder %v5183_v47, %v406_v43  ;;  %v5422_v15 = vcvt.s32.f32 %v852_v30  ;;  %v5424_v38 = vcvt.s32.f32 %v866_v42 }
 0x1d3   :  { %v5427_v39 = vsel %vm438_vm13, %v5192_v52, 128  ;;  %v5430_v27 = vsel %vm439_vm14, %v5192_v52, 128 }
 0x1d4   :  { %6756 = vst [vmem:[#allocation22_spill] sm:$0xff] %v5422_v15  ;;  %6757 = vst [vmem:[#allocation23_spill] sm:$0xff] %v5424_v38  ;;  %855 = vmin.xlane.f32.xlu1 %v5422_v15  ;;  %869 = vmin.xlane.f32.xlu0 %v5424_v38  ;;  %v880_v34 = vshra.s32 %v5427_v39, 16  ;;  %v894_v46 = vshra.s32 %v5430_v27, 16  ;;  %v3928_v15 = vld [vmem:[#allocation7 + $0x78] sm:$0xff] }
 0x1d5   :  { %6758 = vst [vmem:[#allocation24_spill] sm:$0xff] %v5427_v39  ;;  %v408_v13 = vpop.xlane.xlu1 %407  ;;  %v3927_v39 = vld [vmem:[#allocation7 + $0x70] sm:$0xff]  ;;  %4769 = vmatprep.subr.mxu1 %v3928_v15 }
 0x1d6   :  { %vm440_vm15 = vcmp.eq.f32.partialorder %v5188_v48, %v408_v13  ;;  %v5437_v47 = vcvt.s32.f32 %v880_v34  ;;  %v5439_v30 = vcvt.s32.f32 %v894_v46  ;;  %4770 = vmatpush3.msra.mxu1 %v3928_v15  ;;  %v3926_v48 = vld [vmem:[#allocation7 + $0x68] sm:$0xff]  ;;  %v3925_v34 = vld [vmem:[#allocation7 + $0x60] sm:$0xff]  ;;  %v3924_v46 = vld [vmem:[#allocation7 + $0x58] sm:$0xff] }
 0x1d7   :  { %v5442_v42 = vsel %vm440_vm15, %v5192_v52, 128  ;;  %4771 = vmatprep.subr.mxu1 %v3927_v39  ;;  %v3923_v13 = vld [vmem:[#allocation7 + $0x50] sm:$0xff]  ;;  %v3921_v52 = vld [vmem:[#allocation7 + $0x40] sm:$0xff] }
 0x1d8   :  { %6759 = vst [vmem:[#allocation25_spill] sm:$0xff] %v5437_v47  ;;  %6760 = vst [vmem:[#allocation26_spill] sm:$0xff] %v5439_v30  ;;  %883 = vmin.xlane.f32.xlu1 %v5437_v47  ;;  %897 = vmin.xlane.f32.xlu0 %v5439_v30  ;;  %v908_v43 = vshra.s32 %v5442_v42, 16  ;;  %v3919_v15 = vld [vmem:[#allocation7 + $0x30] sm:$0xff]  ;;  %v529_v47 = vand.u32 65535, %v5222_v12  ;;  %v557_v12 = vand.u32 65535, %v5238_v24 }
 0x1d9   :  { %4772 = vmatpush3.msra.mxu1 %v3927_v39  ;;  %v3918_v39 = vld [vmem:[#allocation7 + $0x28] sm:$0xff]  ;;  %v585_v24 = vand.u32 65535, %v5254_v36  ;;  %v599_v36 = vand.u32 65535, %v5267_v45 }
 0x1da   :  { %v5447_v38 = vcvt.s32.f32 %v908_v43  ;;  %4773 = vmatprep.subr.mxu1 %v3926_v48  ;;  %v3922_v43 = vld [vmem:[#allocation7 + $0x48] sm:$0xff] }
 0x1db   :  { %4774 = vmatpush3.msra.mxu1 %v3926_v48  ;;  %v3917_v48 = vld [vmem:[#allocation7 + $0x20] sm:$0xff]  ;;  %v601_v45 = vcvt.s32.f32 %v599_v36  ;;  %v4999_v36 = vmov 0  }
 0x1dc   :  { %6761 = vst [vmem:[#allocation27_spill] sm:$0xff] %v5447_v38  ;;  %911 = vmin.xlane.f32.xlu1 %v5447_v38  ;;  %4775 = vmatprep.subr.mxu1 %v3925_v34  ;;  %v3920_v38 = vld [vmem:[#allocation7 + $0x38] sm:$0xff] }
 0x1dd   :  { %4776 = vmatpush3.msra.mxu1 %v3925_v34  ;;  %v473_v34 = vand.u32 65535, %v5196_v56  ;;  %v515_v56 = vand.u32 65535, %v5219_v9  ;;  %v543_v9 = vand.u32 65535, %v5235_v21  ;;  %v571_v21 = vand.u32 65535, %v5251_v33  ;;  %4861 = vset.pattern.permute.xlu0 %v4999_v36 }
 0x1de   :  { %4777 = vmatprep.subr.mxu1 %v3924_v46  ;;  %v587_v33 = vcvt.s32.f32 %v585_v24  ;;  %4860 = vset.pattern.permute.xlu1 %v4999_v36  ;;  %v6763_v36 = vld [vmem:[#allocation18_spill] sm:$0xff] }
 0x1df   :  { %4778 = vmatpush3.msra.mxu1 %v3924_v46 }
 0x1e0   :  { %4779 = vmatprep.subr.mxu1 %v3923_v13 }
 0x1e1   :  { %4780 = vmatpush3.msra.mxu1 %v3923_v13  ;;  %v475_v13 = vcvt.s32.f32 %v473_v34 }
 0x1e2   :  { %4781 = vmatprep.subr.mxu1 %v3922_v43 }
 0x1e3   :  { %4782 = vmatpush3.msra.mxu1 %v3922_v43  ;;  %v487_v43 = vand.u32 65535, %v5207_v1 }
 0x1e4   :  { %4783 = vmatprep.subr.mxu1 %v3921_v52 }
 0x1e5   :  { %4784 = vmatpush3.msra.mxu1 %v3921_v52  ;;  %v501_v52 = vand.u32 65535, %v5204_v0 }
 0x1e6   :  { %4785 = vmatprep.subr.mxu1 %v3920_v38 }
 0x1e7   :  { %4786 = vmatpush3.msra.mxu1 %v3920_v38 }
 0x1e8   :  { %4787 = vmatprep.subr.mxu1 %v3919_v15 }
 0x1e9   :  { %4788 = vmatpush3.msra.mxu1 %v3919_v15 }
 0x1ea   :  { %4789 = vmatprep.subr.mxu1 %v3918_v39 }
 0x1eb   :  { %4790 = vmatpush3.msra.mxu1 %v3918_v39  ;;  %v489_v39 = vcvt.s32.f32 %v487_v43  ;;  %v531_v43 = vcvt.s32.f32 %v529_v47  ;;  %v559_v47 = vcvt.s32.f32 %v557_v12 }
 0x1ec   :  { %4791 = vmatprep.subr.mxu1 %v3917_v48 }
 0x1ed   :  { %4792 = vmatpush3.msra.mxu1 %v3917_v48  ;;  %v503_v48 = vcvt.s32.f32 %v501_v52 }
 0x225   :  { %v5451_v46 = vpop.xlane.xlu0 %477 }
 0x226   :  { %vm479_vm0 = vcmp.eq.f32.partialorder %v5201_v49, %v5451_v46 }
 0x227   :  { %v480_v38 = vsel %vm479_vm0, %v475_v13, inf  ;;  %v517_v13 = vcvt.s32.f32 %v515_v56  ;;  %v3915_v56 = vld [vmem:[#allocation7 + $0x10] sm:$0xff] }
 0x228   :  { %481 = vmin.xlane.f32.xlu0 %v480_v38 }
 0x229   :  { %v5457_v15 = vpop.xlane.xlu1 %491  ;;  %v5459_v30 = vpop.xlane.xlu0 %505 }
 0x22a   :  { %vm493_vm1 = vcmp.eq.f32.partialorder %v5216_v55, %v5457_v15  ;;  %vm507_vm2 = vcmp.eq.f32.partialorder %v5214_v54, %v5459_v30 }
 0x22b   :  { %v494_v0 = vsel %vm493_vm1, %v489_v39, inf  ;;  %v508_v49 = vsel %vm507_vm2, %v503_v48, inf  ;;  %v545_v39 = vcvt.s32.f32 %v543_v9  ;;  %v3916_v48 = vld [vmem:[#allocation7 + $0x18] sm:$0xff]  ;;  %v3914_v9 = vld [vmem:[#allocation7 + $0x8] sm:$0xff] }
 0x22c   :  { %495 = vmin.xlane.f32.xlu1 %v494_v0  ;;  %509 = vmin.xlane.f32.xlu0 %v508_v49 }
 0x22d   :  { %v5467_v1 = vpop.xlane.xlu1 %519  ;;  %v5469_v34 = vpop.xlane.xlu0 %533  ;;  %4793 = vmatprep.subr.mxu1 %v3916_v48 }
 0x22e   :  { %vm521_vm3 = vcmp.eq.f32.partialorder %v5230_v17, %v5467_v1  ;;  %vm535_vm4 = vcmp.eq.f32.partialorder %v5232_v20, %v5469_v34  ;;  %4794 = vmatpush3.msra.mxu1 %v3916_v48 }
 0x22f   :  { %v522_v54 = vsel %vm521_vm3, %v517_v13, inf  ;;  %v536_v55 = vsel %vm535_vm4, %v531_v43, inf  ;;  %v573_v13 = vcvt.s32.f32 %v571_v21  ;;  %v613_v43 = vand.u32 65535, %v5270_v53  ;;  %4795 = vmatprep.subr.mxu1 %v3915_v56 }
 0x230   :  { %523 = vmin.xlane.f32.xlu1 %v522_v54  ;;  %537 = vmin.xlane.f32.xlu0 %v536_v55  ;;  %v627_v55 = vand.u32 65535, %v5283_v4 }
 0x231   :  { %v5477_v52 = vpop.xlane.xlu1 %547  ;;  %v5479_v38 = vpop.xlane.xlu0 %561  ;;  %v615_v53 = vcvt.s32.f32 %v613_v43  ;;  %4796 = vmatpush3.msra.mxu1 %v3915_v56 }
 0x232   :  { %vm549_vm5 = vcmp.eq.f32.partialorder %v5246_v29, %v5477_v52  ;;  %vm563_vm6 = vcmp.eq.f32.partialorder %v5248_v32, %v5479_v38  ;;  %4797 = vmatprep.subr.mxu1 %v3914_v9  ;;  %v629_v4 = vcvt.s32.f32 %v627_v55 }
 0x233   :  { %v550_v17 = vsel %vm549_vm5, %v545_v39, inf  ;;  %v564_v20 = vsel %vm563_vm6, %v559_v47, inf  ;;  %4798 = vmatpush3.msra.mxu1 %v3914_v9  ;;  %v725_v9 = vand.u32 65535, %v5334_v8  ;;  %v753_v8 = vand.u32 65535, %v5350_v28 }
 0x234   :  { %551 = vmin.xlane.f32.xlu1 %v550_v17  ;;  %565 = vmin.xlane.f32.xlu0 %v564_v20  ;;  %v655_v17 = vand.u32 65535, %v5299_v59  ;;  %v781_v28 = vand.u32 65535, %v5366_v10  ;;  %v795_v10 = vand.u32 65535, %v5379_v26  ;;  %v823_v26 = vand.u32 65535, %v5395_v31 }
 0x235   :  { %v5487_v0 = vpop.xlane.xlu1 %575  ;;  %v5489_v49 = vpop.xlane.xlu0 %589  ;;  %v851_v31 = vand.u32 65535, %v5411_v35 }
 0x236   :  { %vm577_vm7 = vcmp.eq.f32.partialorder %v5262_v41, %v5487_v0  ;;  %vm591_vm8 = vcmp.eq.f32.partialorder %v5264_v44, %v5489_v49  ;;  %v641_v41 = vand.u32 65535, %v5286_v5  ;;  %v3913_v44 = vld [vmem:[#allocation7] sm:$0xff] }
 0x237   :  { %v578_v29 = vsel %vm577_vm7, %v573_v13, inf  ;;  %v592_v32 = vsel %vm591_vm8, %v587_v33, inf  ;;  %4799 = vmatprep.subr.mxu1 %v3913_v44  ;;  %v657_v13 = vcvt.s32.f32 %v655_v17  ;;  %v697_v33 = vand.u32 65535, %v5318_v40 }
 0x238   :  { %579 = vmin.xlane.f32.xlu1 %v578_v29  ;;  %593 = vmin.xlane.f32.xlu0 %v592_v32  ;;  %v643_v5 = vcvt.s32.f32 %v641_v41  ;;  %v711_v40 = vand.u32 65535, %v5331_v7  ;;  %v727_v41 = vcvt.s32.f32 %v725_v9  ;;  %v739_v7 = vand.u32 65535, %v5347_v14 }
 0x239   :  { %v5497_v12 = vpop.xlane.xlu1 %603  ;;  %v5499_v54 = vpop.xlane.xlu0 %617  ;;  %4800 = vmatpush3.msra.mxu1 %v3913_v44  ;;  %v699_v32 = vcvt.s32.f32 %v697_v33  ;;  %v767_v14 = vand.u32 65535, %v5363_v19  ;;  %v783_v19 = vcvt.s32.f32 %v781_v28 }
 0x23a   :  { %vm605_vm9 = vcmp.eq.f32.partialorder %v5278_v61, %v5497_v12  ;;  %vm619_vm10 = vcmp.eq.f32.partialorder %v5280_v51, %v5499_v54  ;;  %v669_v61 = vand.u32 65535, %v5302_v25  ;;  %v683_v25 = vand.u32 65535, %v5315_v2 }
 0x23b   :  { %v606_v39 = vsel %vm605_vm9, %v601_v45, inf  ;;  %v620_v47 = vsel %vm619_vm10, %v615_v53, inf  ;;  %v713_v55 = vcvt.s32.f32 %v711_v40  ;;  %v825_v40 = vcvt.s32.f32 %v823_v26 }
 0x23c   :  { %607 = vmin.xlane.f32.xlu1 %v606_v39  ;;  %621 = vmin.xlane.f32.xlu0 %v620_v47  ;;  %v671_v59 = vcvt.s32.f32 %v669_v61  ;;  %v685_v2 = vcvt.s32.f32 %v683_v25  ;;  %v741_v47 = vcvt.s32.f32 %v739_v7  ;;  %v797_v25 = vcvt.s32.f32 %v795_v10  ;;  %v6770_v10 = vld [vmem:[#allocation25_spill] sm:$0xff] }
 0x23d   :  { %v5507_v21 = vpop.xlane.xlu1 %631  ;;  %v5509_v24 = vpop.xlane.xlu0 %645 }
 0x23e   :  { %vm633_vm11 = vcmp.eq.f32.partialorder %v5294_v58, %v5507_v21  ;;  %vm647_vm12 = vcmp.eq.f32.partialorder %v5296_v16, %v5509_v24 }
 0x23f   :  { %v634_v51 = vsel %vm633_vm11, %v629_v4, inf  ;;  %v648_v20 = vsel %vm647_vm12, %v643_v5, inf  ;;  %v755_v4 = vcvt.s32.f32 %v753_v8  ;;  %v809_v5 = vand.u32 65535, %v5382_v3 }
 0x240   :  { %635 = vmin.xlane.f32.xlu1 %v634_v51  ;;  %649 = vmin.xlane.f32.xlu0 %v648_v20  ;;  %v769_v51 = vcvt.s32.f32 %v767_v14  ;;  %v837_v3 = vand.u32 65535, %v5398_v50  ;;  %v865_v50 = vand.u32 65535, %v5414_v22  ;;  %v893_v22 = vand.u32 65535, %v5430_v27  ;;  %v6769_v14 = vld [vmem:[#allocation23_spill] sm:$0xff] }
 0x241   :  { %v5517_v48 = vpop.xlane.xlu1 %659  ;;  %v5519_v56 = vpop.xlane.xlu0 %673  ;;  %v811_v33 = vcvt.s32.f32 %v809_v5 }
 0x242   :  { %vm661_vm13 = vcmp.eq.f32.partialorder %v5310_v63, %v5517_v48  ;;  %vm675_vm14 = vcmp.eq.f32.partialorder %v5312_v37, %v5519_v56  ;;  %v839_v9 = vcvt.s32.f32 %v837_v3 }
 0x243   :  { %v662_v58 = vsel %vm661_vm13, %v657_v13, inf  ;;  %v676_v16 = vsel %vm675_vm14, %v671_v59, inf }
 0x244   :  { %663 = vmin.xlane.f32.xlu1 %v662_v58  ;;  %677 = vmin.xlane.f32.xlu0 %v676_v16 }
 0x245   :  { %v5527_v43 = vpop.xlane.xlu1 %687  ;;  %v5529_v29 = vpop.xlane.xlu0 %701 }
 0x246   :  { %vm689_vm15 = vcmp.eq.f32.partialorder %v5326_v6, %v5527_v43  ;;  %vm703_vm0 = vcmp.eq.f32.partialorder %v5328_v60, %v5529_v29 }
 0x247   :  { %v690_v63 = vsel %vm689_vm15, %v685_v2, inf  ;;  %v704_v37 = vsel %vm703_vm0, %v699_v32, inf }
 0x248   :  { %691 = vmin.xlane.f32.xlu1 %v690_v63  ;;  %705 = vmin.xlane.f32.xlu0 %v704_v37  ;;  %v6765_v63 = vld [vmem:[#allocation20_spill] sm:$0xff]  ;;  %v6766_v37 = vld [vmem:[#allocation21_spill] sm:$0xff] }
 0x249   :  { %v5537_v45 = vpop.xlane.xlu1 %715  ;;  %v5539_v53 = vpop.xlane.xlu0 %729 }
 0x24a   :  { %vm717_vm1 = vcmp.eq.f32.partialorder %v5342_v11, %v5537_v45  ;;  %vm731_vm2 = vcmp.eq.f32.partialorder %v5344_v62, %v5539_v53 }
 0x24b   :  { %v718_v6 = vsel %vm717_vm1, %v713_v55, inf  ;;  %v732_v60 = vsel %vm731_vm2, %v727_v41, inf }
 0x24c   :  { %719 = vmin.xlane.f32.xlu1 %v718_v6  ;;  %733 = vmin.xlane.f32.xlu0 %v732_v60  ;;  %v853_v6 = vcvt.s32.f32 %v851_v31  ;;  %v867_v60 = vcvt.s32.f32 %v865_v50  ;;  %v554_v50 = vcvt.f32.s32 %v5477_v52 }
 0x24d   :  { %v5547_v44 = vpop.xlane.xlu1 %743  ;;  %v5549_v39 = vpop.xlane.xlu0 %757 }
 0x24e   :  { %vm745_vm3 = vcmp.eq.f32.partialorder %v5358_v18, %v5547_v44  ;;  %vm759_vm4 = vcmp.eq.f32.partialorder %v5360_v57, %v5549_v39  ;;  %v6762_v18 = vld [vmem:[#allocation17_spill] sm:$0xff] }
 0x24f   :  { %v746_v11 = vsel %vm745_vm3, %v741_v47, inf  ;;  %v760_v62 = vsel %vm759_vm4, %v755_v4, inf  ;;  %v6767_v47 = vld [vmem:[#allocation24_spill] sm:$0xff]  ;;  %v6768_v4 = vld [vmem:[#allocation22_spill] sm:$0xff] }
 0x250   :  { %747 = vmin.xlane.f32.xlu1 %v746_v11  ;;  %761 = vmin.xlane.f32.xlu0 %v760_v62  ;;  %v879_v35 = vand.u32 65535, %v6767_v47 }
 0x251   :  { %v5558_v17 = vpop.xlane.xlu1 %771  ;;  %v5560_v61 = vpop.xlane.xlu0 %785 }
 0x252   :  { %vm773_vm5 = vcmp.eq.f32.partialorder %v5374_v23, %v5558_v17  ;;  %vm787_vm6 = vcmp.eq.f32.partialorder %v6762_v18, %v5560_v61  ;;  %v6764_v23 = vld [vmem:[#allocation19_spill] sm:$0xff]  ;;  %v881_v5 = vcvt.s32.f32 %v879_v35  ;;  %v6771_v18 = vld [vmem:[#allocation26_spill] sm:$0xff]  ;;  %v624_v35 = vcvt.f32.s32 %v5499_v54 }
 0x253   :  { %v774_v57 = vsel %vm773_vm5, %v769_v51, inf  ;;  %v788_v20 = vsel %vm787_vm6, %v783_v19, inf  ;;  %v895_v51 = vcvt.s32.f32 %v893_v22  ;;  %v907_v19 = vand.u32 65535, %v5442_v42 }
 0x254   :  { %775 = vmin.xlane.f32.xlu1 %v774_v57  ;;  %789 = vmin.xlane.f32.xlu0 %v788_v20  ;;  %v484_v42 = vcvt.f32.s32 %v5451_v46  ;;  %v610_v22 = vcvt.f32.s32 %v5497_v12  ;;  %v666_v12 = vcvt.f32.s32 %v5517_v48 }
 0x255   :  { %v5568_v13 = vpop.xlane.xlu1 %799  ;;  %v5570_v59 = vpop.xlane.xlu0 %813 }
 0x256   :  { %vm801_vm7 = vcmp.eq.f32.partialorder %v6763_v36, %v5568_v13  ;;  %vm815_vm8 = vcmp.eq.f32.partialorder %v6764_v23, %v5570_v59  ;;  %v498_v36 = vcvt.f32.s32 %v5457_v15  ;;  %v512_v23 = vcvt.f32.s32 %v5459_v30 }
 0x257   :  { %v802_v58 = vsel %vm801_vm7, %v797_v25, inf  ;;  %v816_v16 = vsel %vm815_vm8, %v811_v33, inf  ;;  %v909_v25 = vcvt.s32.f32 %v907_v19  ;;  %v6772_v33 = vld [vmem:[#allocation27_spill] sm:$0xff] }
 0x258   :  { %803 = vmin.xlane.f32.xlu1 %v802_v58  ;;  %817 = vmin.xlane.f32.xlu0 %v816_v16  ;;  %v526_v58 = vcvt.f32.s32 %v5467_v1  ;;  %v540_v16 = vcvt.f32.s32 %v5469_v34  ;;  %v5622_v46 = vshll.u32 %v498_v36, 16  ;;  %v5624_v15 = vshll.u32 %v512_v23, 16 }
 0x259   :  { %v5578_v2 = vpop.xlane.xlu1 %827  ;;  %v5580_v32 = vpop.xlane.xlu0 %841  ;;  %v5630_v34 = vshll.u32 %v554_v50, 16  ;;  %v750_v36 = vcvt.f32.s32 %v5547_v44  ;;  %v764_v23 = vcvt.f32.s32 %v5549_v39  ;;  %v820_v50 = vcvt.f32.s32 %v5570_v59 }
 0x25a   :  { %vm829_vm9 = vcmp.eq.f32.partialorder %v6765_v63, %v5578_v2  ;;  %vm843_vm10 = vcmp.eq.f32.partialorder %v6766_v37, %v5580_v32  ;;  %v5620_v63 = vshll.u32 %v484_v42, 16  ;;  %v5000_v37 = vmov 1966171168  }
 0x25b   :  { %v830_v55 = vsel %vm829_vm9, %v825_v40, inf  ;;  %v844_v41 = vsel %vm843_vm10, %v839_v9, inf  ;;  %v568_v40 = vcvt.f32.s32 %v5479_v38  ;;  %v6773_v9 = vlaneseq }
 0x25c   :  { %831 = vmin.xlane.f32.xlu1 %v830_v55  ;;  %845 = vmin.xlane.f32.xlu0 %v844_v41  ;;  %v1950_v55 = vunpack.c.l.s4 %v5000_v37  ;;  %v5626_v30 = vshll.u32 %v526_v58, 16  ;;  %v5628_v1 = vshll.u32 %v540_v16, 16  ;;  %v582_v38 = vcvt.f32.s32 %v5487_v0 }
 0x25d   :  { %v5588_v7 = vpop.xlane.xlu1 %855  ;;  %v5590_v8 = vpop.xlane.xlu0 %869  ;;  %v5618_v31 = vshrl.u32 %v6773_v9, 7  ;;  %v5632_v52 = vshll.u32 %v568_v40, 16  ;;  %v596_v41 = vcvt.f32.s32 %v5489_v49  ;;  %v652_v49 = vcvt.f32.s32 %v5509_v24 }
 0x25e   :  { %vm857_vm11 = vcmp.eq.f32.partialorder %v6768_v4, %v5588_v7  ;;  %vm871_vm12 = vcmp.eq.f32.partialorder %v6769_v14, %v5590_v8  ;;  %v638_v4 = vcvt.f32.s32 %v5507_v21  ;;  %v1951_v0 = vunpack.c.0.s8 %v1950_v55 }
 0x25f   :  { %v858_v28 = vsel %vm857_vm11, %v853_v6, inf  ;;  %v872_v11 = vsel %vm871_vm12, %v867_v60, inf  ;;  %v5638_v6 = vsub.s32 0, %v5618_v31  ;;  %v5641_v60 = vsub.s32 1, %v5618_v31 }
 0x260   :  { %859 = vmin.xlane.f32.xlu1 %v858_v28  ;;  %873 = vmin.xlane.f32.xlu0 %v872_v11  ;;  %v5644_v47 = vsub.s32 2, %v5618_v31  ;;  %v5649_v14 = vsub.s32 3, %v5618_v31  ;;  %v680_v28 = vcvt.f32.s32 %v5519_v56  ;;  %v5654_v11 = vshll.u32 %v582_v38, 16 }
 0x261   :  { %v5597_v62 = vpop.xlane.xlu1 %883  ;;  %v5599_v27 = vpop.xlane.xlu0 %897  ;;  %v5660_v54 = vsub.s32 4, %v5618_v31  ;;  %v5662_v21 = vshll.u32 %v610_v22, 16  ;;  %v5665_v19 = vsub.s32 5, %v5618_v31  ;;  %v5668_v24 = vsub.s32 6, %v5618_v31 }
 0x262   :  { %vm885_vm13 = vcmp.eq.f32.partialorder %v6770_v10, %v5597_v62  ;;  %vm899_vm14 = vcmp.eq.f32.partialorder %v6771_v18, %v5599_v27  ;;  %v5671_v48 = vsub.s32 7, %v5618_v31  ;;  %v5673_v56 = vshll.u32 %v624_v35, 16 }
 0x263   :  { %v886_v57 = vsel %vm885_vm13, %v881_v5, inf  ;;  %v900_v20 = vsel %vm899_vm14, %v895_v51, inf  ;;  %v5656_v5 = vshll.u32 %v596_v41, 16  ;;  %v694_v51 = vcvt.f32.s32 %v5527_v43 }
 0x264   :  { %887 = vmin.xlane.f32.xlu1 %v886_v57  ;;  %901 = vmin.xlane.f32.xlu0 %v900_v20  ;;  %v5675_v10 = vshll.u32 %v638_v4, 16  ;;  %v708_v43 = vcvt.f32.s32 %v5529_v29  ;;  %v5679_v18 = vsub.s32 %v1951_v0, %v5618_v31  ;;  %v5681_v57 = vshll.u32 %v652_v49, 16 }
 0x265   :  { %v5606_v3 = vpop.xlane.xlu1 %911  ;;  %v5683_v20 = vshll.u32 %v666_v12, 16  ;;  %v736_v42 = vcvt.f32.s32 %v5539_v53  ;;  %v778_v29 = vcvt.f32.s32 %v5558_v17  ;;  %v792_v58 = vcvt.f32.s32 %v5560_v61 }
 0x266   :  { %vm913_vm15 = vcmp.eq.f32.partialorder %v6772_v33, %v5606_v3  ;;  %v722_v33 = vcvt.f32.s32 %v5537_v45  ;;  %v806_v16 = vcvt.f32.s32 %v5568_v13  ;;  %v5697_v40 = vshll.u32 %v708_v43, 16 }
 0x267   :  { %v914_v26 = vsel %vm913_vm15, %v909_v25, inf  ;;  %v5685_v25 = vshll.u32 %v680_v28, 16  ;;  %v834_v45 = vcvt.f32.s32 %v5578_v2  ;;  %v848_v37 = vcvt.f32.s32 %v5580_v32 }
 0x268   :  { %915 = vmin.xlane.f32.xlu1 %v914_v26  ;;  %v5688_v26 = vshll.u32 %v694_v51, 16  ;;  %v862_v53 = vcvt.f32.s32 %v5588_v7  ;;  %v5702_v55 = vshll.u32 %v722_v33, 16  ;;  %v876_v44 = vcvt.f32.s32 %v5590_v8 }
 0x269   :  { %v890_v39 = vcvt.f32.s32 %v5597_v62  ;;  %v904_v17 = vcvt.f32.s32 %v5599_v27  ;;  %v5707_v13 = vshll.u32 %v736_v42, 16  ;;  %v5709_v59 = vshll.u32 %v750_v36, 16  ;;  %v6774_v42 = vld [vmem:[#allocation16_spill] sm:$0xff] }
 0x26a   :  { %v5711_v38 = vshll.u32 %v764_v23, 16  ;;  %v5713_v41 = vshll.u32 %v778_v29, 16  ;;  %v5715_v32 = vshll.u32 %v792_v58, 16  ;;  %v5717_v7 = vshll.u32 %v806_v16, 16 }
 0x26b   :  { %v5719_v22 = vshll.u32 %v820_v50, 16  ;;  %v5721_v8 = vshll.u32 %v834_v45, 16  ;;  %v5723_v62 = vshll.u32 %v848_v37, 16  ;;  %v5725_v27 = vshll.u32 %v862_v53, 16 }
 0x26c   :  { %v5728_v4 = vshll.u32 %v876_v44, 16  ;;  %v5730_v0 = vshll.u32 %v890_v39, 16  ;;  %v5732_v49 = vshll.u32 %v904_v17, 16  ;;  %v918_v12 = vcvt.f32.s32 %v5606_v3 }
 0x26d   :  { %v5001_v23 = vmov 1.0  }
 0x26e   :  { %v5748_v53 = vshll.u32 %v918_v12, 16 }
 0x2b1   :  { %v482_v61 = vpop.xlane.xlu0 %481 }
 0x2b2   :  { %v483_v2 = vcvt.f32.s32 %v482_v61 }
 0x2b4   :  { %v486_v35 = vadd.s32 %v5620_v63, %v483_v2 }
 0x2b5   :  { %v496_v28 = vpop.xlane.xlu1 %495  ;;  %v510_v51 = vpop.xlane.xlu0 %509 }
 0x2b6   :  { %v497_v43 = vcvt.f32.s32 %v496_v28  ;;  %v511_v33 = vcvt.f32.s32 %v510_v51  ;;  %vm3817_vm0 = vcmp.eq.s32.totalorder %v6774_v42, %v486_v35  ;;  %v924_v36 = vrot.slane %v486_v35, %v5638_v6 }
 0x2b7   :  { %4801 = vmatprep.mubr.msk.f32.mxu1 %vm3817_vm0, %v5001_v23  ;;  %v928_v63 = vrot.slane %v486_v35, %v5641_v60  ;;  %v932_v29 = vrot.slane %v486_v35, %v5644_v47  ;;  %v936_v58 = vrot.slane %v486_v35, %v5649_v14  ;;  %v940_v16 = vrot.slane %v486_v35, %v5660_v54 }
 0x2b8   :  { %v500_v3 = vadd.s32 %v5622_v46, %v497_v43  ;;  %v5744_v50 = vadd.s32 %v5624_v15, %v511_v33  ;;  %v944_v45 = vrot.slane %v486_v35, %v5665_v19  ;;  %v948_v37 = vrot.slane %v486_v35, %v5668_v24 }
 0x2b9   :  { %v524_v44 = vpop.xlane.xlu1 %523  ;;  %v538_v39 = vpop.xlane.xlu0 %537  ;;  %v952_v17 = vrot.slane %v486_v35, %v5671_v48  ;;  %v1945_v61 = vcombine.low %v924_v36, %v928_v63  ;;  %v1946_v2 = vcombine.low %v932_v29, %v936_v58 }
 0x2ba   :  { %v525_v28 = vcvt.f32.s32 %v524_v44  ;;  %v539_v51 = vcvt.f32.s32 %v538_v39  ;;  %vm3818_vm1 = vcmp.eq.s32.totalorder %v6774_v42, %v500_v3  ;;  %vm3819_vm2 = vcmp.eq.s32.totalorder %v6774_v42, %v5744_v50 }
 0x2bb   :  { %4802 = vmatmul.mubr.msk.f32.vlgmr.msra.gmra.mxu1 %vm3818_vm1, %v5001_v23  ;;  %v1947_v46 = vcombine.low %v940_v16, %v944_v45  ;;  %v1948_v15 = vcombine.low %v948_v37, %v952_v17  ;;  %v1955_v12 = vrot.slane %v1945_v61, %v5679_v18  ;;  %v1962_v43 = vrot.slane %v1946_v2, %v5679_v18 }
 0x2bc   :  { %v5758_v33 = vadd.s32 %v5626_v30, %v525_v28  ;;  %v5761_v35 = vadd.s32 %v5628_v1, %v539_v51  ;;  %4804 = vmatprep.mubr.msk.f32.mxu1 %vm3819_vm2, %v5001_v23  ;;  %v956_v36 = vrot.slane %v500_v3, %v5638_v6  ;;  %v960_v63 = vrot.slane %v500_v3, %v5641_v60 }
 0x2bd   :  { %v552_v29 = vpop.xlane.xlu1 %551  ;;  %v566_v58 = vpop.xlane.xlu0 %565  ;;  %v1969_v16 = vrot.slane %v1947_v46, %v5679_v18  ;;  %v1976_v45 = vrot.slane %v1948_v15, %v5679_v18  ;;  %v1977_v37 = vcombine.low %v1955_v12, %v1962_v43  ;;  %v964_v44 = vrot.slane %v500_v3, %v5644_v47 }
 0x2be   :  { %v553_v30 = vcvt.f32.s32 %v552_v29  ;;  %v567_v39 = vcvt.f32.s32 %v566_v58  ;;  %vm3820_vm3 = vcmp.eq.s32.totalorder %v6774_v42, %v5758_v33  ;;  %vm3821_vm4 = vcmp.eq.s32.totalorder %v6774_v42, %v5761_v35 }
 0x2bf   :  { %4805 = vmatmul.mubr.msk.f32.gmra.mxu1 %vm3820_vm3, %v5001_v23  ;;  %v1978_v1 = vcombine.low %v1969_v16, %v1976_v45  ;;  %v1985_v17 = vrot.slane %v1977_v37, %v5679_v18  ;;  %v968_v61 = vrot.slane %v500_v3, %v5649_v14  ;;  %v972_v2 = vrot.slane %v500_v3, %v5660_v54 }
 0x2c0   :  { %v5778_v28 = vadd.s32 %v5630_v34, %v553_v30  ;;  %v5781_v51 = vadd.s32 %v5632_v52, %v567_v39  ;;  %4807 = vmatprep.mubr.msk.f32.mxu1 %vm3821_vm4, %v5001_v23  ;;  %v976_v46 = vrot.slane %v500_v3, %v5665_v19  ;;  %v980_v15 = vrot.slane %v500_v3, %v5668_v24 }
 0x2c1   :  { %v580_v12 = vpop.xlane.xlu1 %579  ;;  %v594_v43 = vpop.xlane.xlu0 %593  ;;  %v1992_v29 = vrot.slane %v1978_v1, %v5679_v18  ;;  %v984_v58 = vrot.slane %v500_v3, %v5671_v48  ;;  %v1994_v16 = vcombine.low %v956_v36, %v960_v63  ;;  %v1995_v45 = vcombine.low %v964_v44, %v968_v61 }
 0x2c2   :  { %v581_v37 = vcvt.f32.s32 %v580_v12  ;;  %v595_v34 = vcvt.f32.s32 %v594_v43  ;;  %vm3822_vm5 = vcmp.eq.s32.totalorder %v6774_v42, %v5778_v28  ;;  %vm3823_vm6 = vcmp.eq.s32.totalorder %v6774_v42, %v5781_v51 }
 0x2c3   :  { %v1993_v52 = vcombine.low %v1985_v17, %v1992_v29  ;;  %4808 = vmatmul.mubr.msk.f32.gmra.mxu1 %vm3822_vm5, %v5001_v23  ;;  %v1996_v30 = vcombine.low %v972_v2, %v976_v46  ;;  %v1997_v39 = vcombine.low %v980_v15, %v984_v58  ;;  %v2004_v9 = vrot.slane %v1994_v16, %v5679_v18 }
 0x2c4   :  { %v5795_v1 = vadd.s32 %v5654_v11, %v581_v37  ;;  %v5798_v3 = vadd.s32 %v5656_v5, %v595_v34  ;;  %4810 = vmatprep.mubr.msk.f32.mxu1 %vm3823_vm6, %v5001_v23  ;;  %v2011_v36 = vrot.slane %v1995_v45, %v5679_v18  ;;  %v1020_v63 = vrot.slane %v5758_v33, %v5638_v6 }
 0x2c5   :  { %3514 = vperm.xlu0 %4861, %v1993_v52   ;;  %v608_v44 = vpop.xlane.xlu1 %607  ;;  %v622_v17 = vpop.xlane.xlu0 %621  ;;  %v2018_v61 = vrot.slane %v1996_v30, %v5679_v18  ;;  %v2025_v2 = vrot.slane %v1997_v39, %v5679_v18  ;;  %v1024_v11 = vrot.slane %v5758_v33, %v5641_v60  ;;  %v1028_v5 = vrot.slane %v5758_v33, %v5644_v47 }
 0x2c6   :  { %v609_v46 = vcvt.f32.s32 %v608_v44  ;;  %v623_v15 = vcvt.f32.s32 %v622_v17  ;;  %v2026_v12 = vcombine.low %v2004_v9, %v2011_v36  ;;  %vm3824_vm7 = vcmp.eq.s32.totalorder %v6774_v42, %v5795_v1 }
 0x2c7   :  { %v2027_v43 = vcombine.low %v2018_v61, %v2025_v2  ;;  %4811 = vmatmul.mubr.msk.f32.gmra.mxu1 %vm3824_vm7, %v5001_v23  ;;  %vm3825_vm8 = vcmp.eq.s32.totalorder %v6774_v42, %v5798_v3  ;;  %v1032_v29 = vrot.slane %v5758_v33, %v5649_v14  ;;  %v1036_v58 = vrot.slane %v5758_v33, %v5660_v54 }
 0x2c8   :  { %v5820_v16 = vadd.s32 %v5662_v21, %v609_v46  ;;  %v5823_v9 = vadd.s32 %v5673_v56, %v623_v15  ;;  %v2034_v45 = vrot.slane %v2026_v12, %v5679_v18  ;;  %4813 = vmatprep.mubr.msk.f32.mxu1 %vm3825_vm8, %v5001_v23  ;;  %v1040_v37 = vrot.slane %v5758_v33, %v5665_v19 }
 0x2c9   :  { %v2041_v34 = vrot.slane %v2027_v43, %v5679_v18  ;;  %v636_v52 = vpop.xlane.xlu1 %635  ;;  %v650_v30 = vpop.xlane.xlu0 %649  ;;  %v1044_v39 = vrot.slane %v5758_v33, %v5668_v24  ;;  %v1048_v21 = vrot.slane %v5758_v33, %v5671_v48  ;;  %v2092_v36 = vcombine.low %v1020_v63, %v1024_v11 }
 0x2ca   :  { %v637_v56 = vcvt.f32.s32 %v636_v52  ;;  %v651_v44 = vcvt.f32.s32 %v650_v30  ;;  %v2093_v17 = vcombine.low %v1028_v5, %v1032_v29  ;;  %v2094_v61 = vcombine.low %v1036_v58, %v1040_v37 }
 0x2cb   :  { %v2042_v2 = vcombine.low %v2034_v45, %v2041_v34  ;;  %v2095_v46 = vcombine.low %v1044_v39, %v1048_v21  ;;  %v2102_v15 = vrot.slane %v2092_v36, %v5679_v18  ;;  %vm3826_vm9 = vcmp.eq.s32.totalorder %v6774_v42, %v5820_v16 }
 0x2cc   :  { %v5838_v12 = vadd.s32 %v5675_v10, %v637_v56  ;;  %v5841_v43 = vadd.s32 %v5681_v57, %v651_v44  ;;  %v2109_v33 = vrot.slane %v2093_v17, %v5679_v18  ;;  %v2116_v63 = vrot.slane %v2094_v61, %v5679_v18  ;;  %4814 = vmatmul.mubr.msk.f32.gmra.mxu1 %vm3826_vm9, %v5001_v23 }
 0x2cd   :  { %3517 = vperm.xlu1 %4860, %v2042_v2   ;;  %v2123_v11 = vrot.slane %v2095_v46, %v5679_v18  ;;  %vm3827_vm10 = vcmp.eq.s32.totalorder %v6774_v42, %v5823_v9  ;;  %v664_v5 = vpop.xlane.xlu1 %663  ;;  %v678_v29 = vpop.xlane.xlu0 %677  ;;  %v988_v10 = vrot.slane %v5744_v50, %v5638_v6  ;;  %v992_v57 = vrot.slane %v5744_v50, %v5641_v60 }
 0x2ce   :  { %v2124_v58 = vcombine.low %v2102_v15, %v2109_v33  ;;  %4816 = vmatprep.mubr.msk.f32.mxu1 %vm3827_vm10, %v5001_v23  ;;  %v665_v45 = vcvt.f32.s32 %v664_v5  ;;  %v679_v37 = vcvt.f32.s32 %v678_v29  ;;  %v996_v34 = vrot.slane %v5744_v50, %v5644_v47 }
 0x2cf   :  { %v2125_v52 = vcombine.low %v2116_v63, %v2123_v11  ;;  %v1000_v30 = vrot.slane %v5744_v50, %v5649_v14  ;;  %v1004_v39 = vrot.slane %v5744_v50, %v5660_v54  ;;  %v1008_v21 = vrot.slane %v5744_v50, %v5665_v19 }
 0x2d0   :  { %v2132_v36 = vrot.slane %v2124_v58, %v5679_v18  ;;  %v5864_v56 = vadd.s32 %v5683_v20, %v665_v45  ;;  %v5867_v44 = vadd.s32 %v5685_v25, %v679_v37  ;;  %v1012_v17 = vrot.slane %v5744_v50, %v5668_v24 }
 0x2d1   :  { %v2139_v61 = vrot.slane %v2125_v52, %v5679_v18  ;;  %v1016_v2 = vrot.slane %v5744_v50, %v5671_v48  ;;  %v2043_v46 = vcombine.low %v988_v10, %v992_v57  ;;  %v2044_v15 = vcombine.low %v996_v34, %v1000_v30  ;;  %v692_v33 = vpop.xlane.xlu1 %691  ;;  %v706_v63 = vpop.xlane.xlu0 %705 }
 0x2d2   :  { %v2045_v11 = vcombine.low %v1004_v39, %v1008_v21  ;;  %vm3828_vm11 = vcmp.eq.s32.totalorder %v6774_v42, %v5838_v12  ;;  %vm3829_vm12 = vcmp.eq.s32.totalorder %v6774_v42, %v5841_v43  ;;  %v693_v20 = vcvt.f32.s32 %v692_v33 }
 0x2d3   :  { %v2140_v25 = vcombine.low %v2132_v36, %v2139_v61  ;;  %v2046_v5 = vcombine.low %v1012_v17, %v1016_v2  ;;  %v2053_v29 = vrot.slane %v2043_v46, %v5679_v18  ;;  %v2060_v58 = vrot.slane %v2044_v15, %v5679_v18  ;;  %4817 = vmatmul.mubr.msk.f32.gmra.mxu1 %vm3828_vm11, %v5001_v23 }
 0x2d4   :  { %v2067_v50 = vrot.slane %v2045_v11, %v5679_v18  ;;  %4819 = vmatprep.mubr.msk.f32.mxu1 %vm3829_vm12, %v5001_v23  ;;  %v5884_v10 = vadd.s32 %v5688_v26, %v693_v20  ;;  %v707_v57 = vcvt.f32.s32 %v706_v63  ;;  %v1084_v45 = vrot.slane %v5778_v28, %v5638_v6 }
 0x2d5   :  { %3523 = vperm.xlu1 %4860, %v2140_v25   ;;  %v2074_v37 = vrot.slane %v2046_v5, %v5679_v18  ;;  %v2075_v34 = vcombine.low %v2053_v29, %v2060_v58  ;;  %v1088_v52 = vrot.slane %v5778_v28, %v5641_v60  ;;  %v1092_v30 = vrot.slane %v5778_v28, %v5644_v47  ;;  %v720_v17 = vpop.xlane.xlu1 %719  ;;  %v734_v15 = vpop.xlane.xlu0 %733 }
 0x2d6   :  { %v5894_v39 = vadd.s32 %v5697_v40, %v707_v57  ;;  %v1096_v26 = vrot.slane %v5778_v28, %v5649_v14  ;;  %v1100_v21 = vrot.slane %v5778_v28, %v5660_v54  ;;  %v1104_v36 = vrot.slane %v5778_v28, %v5665_v19 }
 0x2d7   :  { %v2076_v61 = vcombine.low %v2067_v50, %v2074_v37  ;;  %v2083_v2 = vrot.slane %v2075_v34, %v5679_v18  ;;  %v1108_v46 = vrot.slane %v5778_v28, %v5668_v24  ;;  %v1112_v40 = vrot.slane %v5778_v28, %v5671_v48 }
 0x2d8   :  { %v2190_v33 = vcombine.low %v1084_v45, %v1088_v52  ;;  %v2191_v63 = vcombine.low %v1092_v30, %v1096_v26  ;;  %v2192_v11 = vcombine.low %v1100_v21, %v1104_v36  ;;  %vm3830_vm13 = vcmp.eq.s32.totalorder %v6774_v42, %v5864_v56 }
 0x2d9   :  { %v2090_v20 = vrot.slane %v2076_v61, %v5679_v18  ;;  %v2193_v25 = vcombine.low %v1108_v46, %v1112_v40  ;;  %4820 = vmatmul.mubr.msk.f32.gmra.mxu1 %vm3830_vm13, %v5001_v23  ;;  %vm3831_vm14 = vcmp.eq.s32.totalorder %v6774_v42, %v5867_v44  ;;  %v721_v5 = vcvt.f32.s32 %v720_v17 }
 0x2da   :  { %v2200_v29 = vrot.slane %v2190_v33, %v5679_v18  ;;  %v2207_v28 = vrot.slane %v2191_v63, %v5679_v18  ;;  %v2214_v58 = vrot.slane %v2192_v11, %v5679_v18  ;;  %4822 = vmatprep.mubr.msk.f32.mxu1 %vm3831_vm14, %v5001_v23  ;;  %v735_v50 = vcvt.f32.s32 %v734_v15 }
 0x2db   :  { %v2091_v57 = vcombine.low %v2083_v2, %v2090_v20  ;;  %v2221_v45 = vrot.slane %v2193_v25, %v5679_v18  ;;  %v5919_v37 = vadd.s32 %v5702_v55, %v721_v5  ;;  %v1212_v34 = vrot.slane %v5820_v16, %v5638_v6 }
 0x2dc   :  { %v2222_v52 = vcombine.low %v2200_v29, %v2207_v28  ;;  %v5924_v30 = vadd.s32 %v5707_v13, %v735_v50  ;;  %v1216_v26 = vrot.slane %v5820_v16, %v5641_v60  ;;  %v1220_v21 = vrot.slane %v5820_v16, %v5644_v47 }
 0x2dd   :  { %3520 = vperm.xlu1 %4860, %v2091_v57   ;;  %v2223_v36 = vcombine.low %v2214_v58, %v2221_v45  ;;  %v1224_v17 = vrot.slane %v5820_v16, %v5649_v14  ;;  %v1228_v55 = vrot.slane %v5820_v16, %v5660_v54  ;;  %v1232_v61 = vrot.slane %v5820_v16, %v5665_v19 }
 0x2de   :  { %v2230_v13 = vrot.slane %v2222_v52, %v5679_v18  ;;  %v1236_v2 = vrot.slane %v5820_v16, %v5668_v24  ;;  %v1240_v46 = vrot.slane %v5820_v16, %v5671_v48  ;;  %v2386_v40 = vcombine.low %v1212_v34, %v1216_v26 }
 0x2df   :  { %v2237_v15 = vrot.slane %v2223_v36, %v5679_v18  ;;  %v2387_v33 = vcombine.low %v1220_v21, %v1224_v17  ;;  %v2388_v63 = vcombine.low %v1228_v55, %v1232_v61  ;;  %v1052_v11 = vrot.slane %v5761_v35, %v5638_v6  ;;  %v748_v55 = vpop.xlane.xlu1 %747  ;;  %v762_v61 = vpop.xlane.xlu0 %761 }
 0x2e0   :  { %v2389_v20 = vcombine.low %v1236_v2, %v1240_v46  ;;  %v2396_v25 = vrot.slane %v2386_v40, %v5679_v18  ;;  %v1056_v5 = vrot.slane %v5761_v35, %v5641_v60  ;;  %v1060_v29 = vrot.slane %v5761_v35, %v5644_v47 }
 0x2e1   :  { %v2238_v28 = vcombine.low %v2230_v13, %v2237_v15  ;;  %v2403_v16 = vrot.slane %v2387_v33, %v5679_v18  ;;  %v2410_v58 = vrot.slane %v2388_v63, %v5679_v18  ;;  %v1064_v50 = vrot.slane %v5761_v35, %v5649_v14 }
 0x2e2   :  { %v2417_v57 = vrot.slane %v2389_v20, %v5679_v18  ;;  %v1068_v45 = vrot.slane %v5761_v35, %v5660_v54  ;;  %v1072_v34 = vrot.slane %v5761_v35, %v5665_v19  ;;  %v1076_v52 = vrot.slane %v5761_v35, %v5668_v24 }
 0x2e3   :  { %3529 = vperm.xlu1 %4860, %v2238_v28   ;;  %v2418_v26 = vcombine.low %v2396_v25, %v2403_v16  ;;  %v1080_v21 = vrot.slane %v5761_v35, %v5671_v48  ;;  %v2141_v36 = vcombine.low %v1052_v11, %v1056_v5  ;;  %v2142_v17 = vcombine.low %v1060_v29, %v1064_v50 }
 0x2e4   :  { %v2419_v13 = vcombine.low %v2410_v58, %v2417_v57  ;;  %v2143_v2 = vcombine.low %v1068_v45, %v1072_v34  ;;  %vm3832_vm15 = vcmp.eq.s32.totalorder %v6774_v42, %v5884_v10  ;;  %vm3833_vm0 = vcmp.eq.s32.totalorder %v6774_v42, %v5894_v39 }
 0x2e5   :  { %v2426_v46 = vrot.slane %v2418_v26, %v5679_v18  ;;  %v2144_v40 = vcombine.low %v1076_v52, %v1080_v21  ;;  %v2151_v15 = vrot.slane %v2141_v36, %v5679_v18  ;;  %v2158_v33 = vrot.slane %v2142_v17, %v5679_v18  ;;  %4823 = vmatmul.mubr.msk.f32.gmra.mxu1 %vm3832_vm15, %v5001_v23  ;;  %v776_v21 = vpop.xlane.xlu1 %775 }
 0x2e6   :  { %v2433_v35 = vrot.slane %v2419_v13, %v5679_v18  ;;  %v2165_v63 = vrot.slane %v2143_v2, %v5679_v18  ;;  %4825 = vmatprep.mubr.msk.f32.mxu1 %vm3833_vm0, %v5001_v23  ;;  %v749_v11 = vcvt.f32.s32 %v748_v55  ;;  %v763_v20 = vcvt.f32.s32 %v762_v61  ;;  %v790_v55 = vpop.xlane.xlu0 %789 }
 0x2e7   :  { %v2172_v25 = vrot.slane %v2144_v40, %v5679_v18  ;;  %v2173_v5 = vcombine.low %v2151_v15, %v2158_v33  ;;  %v1148_v29 = vrot.slane %v5795_v1, %v5638_v6  ;;  %v1152_v28 = vrot.slane %v5795_v1, %v5641_v60 }
 0x2e8   :  { %v2434_v16 = vcombine.low %v2426_v46, %v2433_v35  ;;  %v5979_v58 = vadd.s32 %v5709_v59, %v749_v11  ;;  %v5982_v50 = vadd.s32 %v5711_v38, %v763_v20  ;;  %v1156_v57 = vrot.slane %v5795_v1, %v5644_v47 }
 0x2e9   :  { %v2174_v45 = vcombine.low %v2165_v63, %v2172_v25  ;;  %v2181_v34 = vrot.slane %v2173_v5, %v5679_v18  ;;  %v1160_v52 = vrot.slane %v5795_v1, %v5649_v14  ;;  %v1164_v26 = vrot.slane %v5795_v1, %v5660_v54 }
 0x2ea   :  { %3541 = vperm.xlu0 %4861, %v2434_v16   ;;  %v1168_v59 = vrot.slane %v5795_v1, %v5665_v19  ;;  %v1172_v38 = vrot.slane %v5795_v1, %v5668_v24  ;;  %v1176_v36 = vrot.slane %v5795_v1, %v5671_v48  ;;  %v2288_v17 = vcombine.low %v1148_v29, %v1152_v28 }
 0x2eb   :  { %v2188_v61 = vrot.slane %v2174_v45, %v5679_v18  ;;  %v2289_v13 = vcombine.low %v1156_v57, %v1160_v52  ;;  %vm3834_vm1 = vcmp.eq.s32.totalorder %v6774_v42, %v5919_v37  ;;  %vm3835_vm2 = vcmp.eq.s32.totalorder %v6774_v42, %v5924_v30 }
 0x2ec   :  { %v2290_v2 = vcombine.low %v1164_v26, %v1168_v59  ;;  %v2291_v46 = vcombine.low %v1172_v38, %v1176_v36  ;;  %v2298_v40 = vrot.slane %v2288_v17, %v5679_v18  ;;  %4826 = vmatmul.mubr.msk.f32.gmra.mxu1 %vm3834_vm1, %v5001_v23  ;;  %v777_v15 = vcvt.f32.s32 %v776_v21  ;;  %v804_v26 = vpop.xlane.xlu1 %803  ;;  %v818_v36 = vpop.xlane.xlu0 %817 }
 0x2ed   :  { %v2189_v33 = vcombine.low %v2181_v34, %v2188_v61  ;;  %v2305_v1 = vrot.slane %v2289_v13, %v5679_v18  ;;  %4828 = vmatprep.mubr.msk.f32.mxu1 %vm3835_vm2, %v5001_v23  ;;  %v791_v35 = vcvt.f32.s32 %v790_v55  ;;  %v1116_v63 = vrot.slane %v5781_v51, %v5638_v6 }
 0x2ee   :  { %v2312_v11 = vrot.slane %v2290_v2, %v5679_v18  ;;  %v2319_v20 = vrot.slane %v2291_v46, %v5679_v18  ;;  %v6011_v25 = vadd.s32 %v5713_v41, %v777_v15  ;;  %v1120_v5 = vrot.slane %v5781_v51, %v5641_v60 }
 0x2ef   :  { %3526 = vperm.xlu1 %4860, %v2189_v33   ;;  %v2320_v29 = vcombine.low %v2298_v40, %v2305_v1  ;;  %v6016_v28 = vadd.s32 %v5715_v32, %v791_v35  ;;  %v1124_v16 = vrot.slane %v5781_v51, %v5644_v47  ;;  %v1128_v57 = vrot.slane %v5781_v51, %v5649_v14 }
 0x2f0   :  { %v2321_v45 = vcombine.low %v2312_v11, %v2319_v20  ;;  %v1132_v34 = vrot.slane %v5781_v51, %v5660_v54  ;;  %v1136_v41 = vrot.slane %v5781_v51, %v5665_v19  ;;  %v1140_v52 = vrot.slane %v5781_v51, %v5668_v24 }
 0x2f1   :  { %v2328_v32 = vrot.slane %v2320_v29, %v5679_v18  ;;  %v1144_v21 = vrot.slane %v5781_v51, %v5671_v48  ;;  %v2239_v59 = vcombine.low %v1116_v63, %v1120_v5  ;;  %v2240_v38 = vcombine.low %v1124_v16, %v1128_v57  ;;  %v832_v57 = vpop.xlane.xlu1 %831 }
 0x2f2   :  { %v2335_v17 = vrot.slane %v2321_v45, %v5679_v18  ;;  %v2241_v55 = vcombine.low %v1132_v34, %v1136_v41  ;;  %vm3836_vm3 = vcmp.eq.s32.totalorder %v6774_v42, %v5979_v58  ;;  %vm3837_vm4 = vcmp.eq.s32.totalorder %v6774_v42, %v5982_v50  ;;  %v846_v41 = vpop.xlane.xlu0 %845 }
 0x2f3   :  { %v2242_v61 = vcombine.low %v1140_v52, %v1144_v21  ;;  %v2249_v13 = vrot.slane %v2239_v59, %v5679_v18  ;;  %v2256_v2 = vrot.slane %v2240_v38, %v5679_v18  ;;  %4829 = vmatmul.mubr.msk.f32.gmra.mxu1 %vm3836_vm3, %v5001_v23  ;;  %v805_v51 = vcvt.f32.s32 %v804_v26 }
 0x2f4   :  { %v2336_v46 = vcombine.low %v2328_v32, %v2335_v17  ;;  %v2263_v40 = vrot.slane %v2241_v55, %v5679_v18  ;;  %4831 = vmatprep.mubr.msk.f32.mxu1 %vm3837_vm4, %v5001_v23  ;;  %v819_v15 = vcvt.f32.s32 %v818_v36  ;;  %v1180_v33 = vrot.slane %v5798_v3, %v5638_v6 }
 0x2f5   :  { %v2270_v1 = vrot.slane %v2242_v61, %v5679_v18  ;;  %v2271_v35 = vcombine.low %v2249_v13, %v2256_v2  ;;  %v6045_v63 = vadd.s32 %v5717_v7, %v805_v51  ;;  %v1184_v11 = vrot.slane %v5798_v3, %v5641_v60 }
 0x2f6   :  { %3535 = vperm.xlu1 %4860, %v2336_v46   ;;  %v6050_v20 = vadd.s32 %v5719_v22, %v819_v15  ;;  %v1188_v5 = vrot.slane %v5798_v3, %v5644_v47  ;;  %v1192_v29 = vrot.slane %v5798_v3, %v5649_v14  ;;  %v1196_v16 = vrot.slane %v5798_v3, %v5660_v54 }
 0x2f7   :  { %v2272_v45 = vcombine.low %v2263_v40, %v2270_v1  ;;  %v2279_v7 = vrot.slane %v2271_v35, %v5679_v18  ;;  %v1200_v34 = vrot.slane %v5798_v3, %v5665_v19  ;;  %v1204_v22 = vrot.slane %v5798_v3, %v5668_v24 }
 0x2f8   :  { %v1208_v52 = vrot.slane %v5798_v3, %v5671_v48  ;;  %v2337_v26 = vcombine.low %v1180_v33, %v1184_v11  ;;  %v2338_v32 = vcombine.low %v1188_v5, %v1192_v29  ;;  %vm3838_vm5 = vcmp.eq.s32.totalorder %v6774_v42, %v6011_v25 }
 0x2f9   :  { %v2286_v21 = vrot.slane %v2272_v45, %v5679_v18  ;;  %v2339_v59 = vcombine.low %v1196_v16, %v1200_v34  ;;  %4832 = vmatmul.mubr.msk.f32.gmra.mxu1 %vm3838_vm5, %v5001_v23  ;;  %vm3839_vm6 = vcmp.eq.s32.totalorder %v6774_v42, %v6016_v28  ;;  %v833_v38 = vcvt.f32.s32 %v832_v57 }
 0x2fa   :  { %v2340_v36 = vcombine.low %v1204_v22, %v1208_v52  ;;  %v2347_v17 = vrot.slane %v2337_v26, %v5679_v18  ;;  %v2354_v55 = vrot.slane %v2338_v32, %v5679_v18  ;;  %4834 = vmatprep.mubr.msk.f32.mxu1 %vm3839_vm6, %v5001_v23  ;;  %v847_v3 = vcvt.f32.s32 %v846_v41 }
 0x2fb   :  { %v2287_v61 = vcombine.low %v2279_v7, %v2286_v21  ;;  %v2361_v13 = vrot.slane %v2339_v59, %v5679_v18  ;;  %v6076_v2 = vadd.s32 %v5721_v8, %v833_v38  ;;  %v1468_v51 = vrot.slane %v5919_v37, %v5638_v6 }
 0x2fc   :  { %v2368_v46 = vrot.slane %v2340_v36, %v5679_v18  ;;  %v2369_v40 = vcombine.low %v2347_v17, %v2354_v55  ;;  %v6082_v15 = vadd.s32 %v5723_v62, %v847_v3  ;;  %v1472_v33 = vrot.slane %v5919_v37, %v5641_v60 }
 0x2fd   :  { %3532 = vperm.xlu1 %4860, %v2287_v61   ;;  %v1476_v1 = vrot.slane %v5919_v37, %v5644_v47  ;;  %v1480_v8 = vrot.slane %v5919_v37, %v5649_v14  ;;  %v1484_v35 = vrot.slane %v5919_v37, %v5660_v54  ;;  %v1488_v11 = vrot.slane %v5919_v37, %v5665_v19 }
 0x2fe   :  { %v2370_v5 = vcombine.low %v2361_v13, %v2368_v46  ;;  %v2377_v62 = vrot.slane %v2369_v40, %v5679_v18  ;;  %v1492_v29 = vrot.slane %v5919_v37, %v5668_v24  ;;  %v1496_v16 = vrot.slane %v5919_v37, %v5671_v48  ;;  %v860_v46 = vpop.xlane.xlu1 %859 }
 0x2ff   :  { %v2778_v57 = vcombine.low %v1468_v51, %v1472_v33  ;;  %v2779_v45 = vcombine.low %v1476_v1, %v1480_v8  ;;  %v2780_v7 = vcombine.low %v1484_v35, %v1488_v11  ;;  %v1276_v34 = vrot.slane %v5838_v12, %v5638_v6  ;;  %v874_v8 = vpop.xlane.xlu0 %873 }
 0x300   :  { %v2384_v22 = vrot.slane %v2370_v5, %v5679_v18  ;;  %v2781_v41 = vcombine.low %v1492_v29, %v1496_v16  ;;  %v1280_v52 = vrot.slane %v5838_v12, %v5641_v60  ;;  %v1284_v26 = vrot.slane %v5838_v12, %v5644_v47 }
 0x301   :  { %v2788_v32 = vrot.slane %v2778_v57, %v5679_v18  ;;  %v2795_v21 = vrot.slane %v2779_v45, %v5679_v18  ;;  %v2802_v37 = vrot.slane %v2780_v7, %v5679_v18  ;;  %v1288_v59 = vrot.slane %v5838_v12, %v5649_v14 }
 0x302   :  { %v2385_v38 = vcombine.low %v2377_v62, %v2384_v22  ;;  %v2809_v36 = vrot.slane %v2781_v41, %v5679_v18  ;;  %v1292_v17 = vrot.slane %v5838_v12, %v5660_v54  ;;  %v1296_v55 = vrot.slane %v5838_v12, %v5665_v19 }
 0x303   :  { %v2810_v3 = vcombine.low %v2788_v32, %v2795_v21  ;;  %v1300_v61 = vrot.slane %v5838_v12, %v5668_v24  ;;  %v1304_v13 = vrot.slane %v5838_v12, %v5671_v48  ;;  %v2484_v51 = vcombine.low %v1276_v34, %v1280_v52 }
 0x304   :  { %3538 = vperm.xlu1 %4860, %v2385_v38   ;;  %v2811_v40 = vcombine.low %v2802_v37, %v2809_v36  ;;  %v2485_v33 = vcombine.low %v1284_v26, %v1288_v59  ;;  %v2486_v1 = vcombine.low %v1292_v17, %v1296_v55  ;;  %vm3840_vm7 = vcmp.eq.s32.totalorder %v6774_v42, %v6045_v63 }
 0x305   :  { %v2818_v35 = vrot.slane %v2810_v3, %v5679_v18  ;;  %v2487_v11 = vcombine.low %v1300_v61, %v1304_v13  ;;  %v2494_v5 = vrot.slane %v2484_v51, %v5679_v18  ;;  %4835 = vmatmul.mubr.msk.f32.gmra.mxu1 %vm3840_vm7, %v5001_v23  ;;  %vm3841_vm8 = vcmp.eq.s32.totalorder %v6774_v42, %v6050_v20 }
 0x306   :  { %v2825_v12 = vrot.slane %v2811_v40, %v5679_v18  ;;  %v2501_v62 = vrot.slane %v2485_v33, %v5679_v18  ;;  %v2508_v29 = vrot.slane %v2486_v1, %v5679_v18  ;;  %4837 = vmatprep.mubr.msk.f32.mxu1 %vm3841_vm8, %v5001_v23  ;;  %v861_v16 = vcvt.f32.s32 %v860_v46 }
 0x307   :  { %v2515_v57 = vrot.slane %v2487_v11, %v5679_v18  ;;  %v875_v45 = vcvt.f32.s32 %v874_v8  ;;  %v1532_v7 = vrot.slane %v5979_v58, %v5638_v6  ;;  %v1536_v34 = vrot.slane %v5979_v58, %v5641_v60 }
 0x308   :  { %v2826_v22 = vcombine.low %v2818_v35, %v2825_v12  ;;  %v2516_v41 = vcombine.low %v2494_v5, %v2501_v62  ;;  %v6137_v52 = vadd.s32 %v5725_v27, %v861_v16  ;;  %v1540_v26 = vrot.slane %v5979_v58, %v5644_v47 }
 0x309   :  { %v2517_v32 = vcombine.low %v2508_v29, %v2515_v57  ;;  %v6142_v21 = vadd.s32 %v5728_v4, %v875_v45  ;;  %v1544_v37 = vrot.slane %v5979_v58, %v5649_v14  ;;  %v1548_v59 = vrot.slane %v5979_v58, %v5660_v54  ;;  %v888_v45 = vpop.xlane.xlu1 %887 }
 0x30a   :  { %3565 = vperm.xlu0 %4861, %v2826_v22   ;;  %v2524_v38 = vrot.slane %v2516_v41, %v5679_v18  ;;  %v1552_v27 = vrot.slane %v5979_v58, %v5665_v19  ;;  %v1556_v36 = vrot.slane %v5979_v58, %v5668_v24  ;;  %v1560_v17 = vrot.slane %v5979_v58, %v5671_v48  ;;  %v902_v41 = vpop.xlane.xlu0 %901 }
 0x30b   :  { %v2531_v4 = vrot.slane %v2517_v32, %v5679_v18  ;;  %v2876_v55 = vcombine.low %v1532_v7, %v1536_v34  ;;  %v2877_v3 = vcombine.low %v1540_v26, %v1544_v37  ;;  %v1244_v61 = vrot.slane %v5823_v9, %v5638_v6 }
 0x30c   :  { %v2878_v13 = vcombine.low %v1548_v59, %v1552_v27  ;;  %v2879_v51 = vcombine.low %v1556_v36, %v1560_v17  ;;  %v1248_v46 = vrot.slane %v5823_v9, %v5641_v60  ;;  %v1252_v40 = vrot.slane %v5823_v9, %v5644_v47 }
 0x30d   :  { %v2532_v33 = vcombine.low %v2524_v38, %v2531_v4  ;;  %v2886_v1 = vrot.slane %v2876_v55, %v5679_v18  ;;  %v2893_v58 = vrot.slane %v2877_v3, %v5679_v18  ;;  %v1256_v8 = vrot.slane %v5823_v9, %v5649_v14 }
 0x30e   :  { %v2900_v35 = vrot.slane %v2878_v13, %v5679_v18  ;;  %v2907_v11 = vrot.slane %v2879_v51, %v5679_v18  ;;  %v1260_v5 = vrot.slane %v5823_v9, %v5660_v54  ;;  %v1264_v12 = vrot.slane %v5823_v9, %v5665_v19 }
 0x30f   :  { %3547 = vperm.xlu1 %4860, %v2532_v33   ;;  %v2908_v62 = vcombine.low %v2886_v1, %v2893_v58  ;;  %v1268_v29 = vrot.slane %v5823_v9, %v5668_v24  ;;  %v1272_v16 = vrot.slane %v5823_v9, %v5671_v48  ;;  %v2435_v57 = vcombine.low %v1244_v61, %v1248_v46 }
 0x310   :  { %v2909_v7 = vcombine.low %v2900_v35, %v2907_v11  ;;  %v2436_v34 = vcombine.low %v1252_v40, %v1256_v8  ;;  %v2437_v22 = vcombine.low %v1260_v5, %v1264_v12  ;;  %vm3842_vm9 = vcmp.eq.s32.totalorder %v6774_v42, %v6076_v2 }
 0x311   :  { %v2916_v26 = vrot.slane %v2908_v62, %v5679_v18  ;;  %v2438_v32 = vcombine.low %v1268_v29, %v1272_v16  ;;  %v2445_v37 = vrot.slane %v2435_v57, %v5679_v18  ;;  %4838 = vmatmul.mubr.msk.f32.gmra.mxu1 %vm3842_vm9, %v5001_v23  ;;  %vm3843_vm10 = vcmp.eq.s32.totalorder %v6774_v42, %v6082_v15 }
 0x312   :  { %v2923_v9 = vrot.slane %v2909_v7, %v5679_v18  ;;  %v2452_v59 = vrot.slane %v2436_v34, %v5679_v18  ;;  %v2459_v38 = vrot.slane %v2437_v22, %v5679_v18  ;;  %4840 = vmatprep.mubr.msk.f32.mxu1 %vm3843_vm10, %v5001_v23  ;;  %v889_v27 = vcvt.f32.s32 %v888_v45 }
 0x313   :  { %v2466_v36 = vrot.slane %v2438_v32, %v5679_v18  ;;  %v903_v17 = vcvt.f32.s32 %v902_v41  ;;  %v1596_v4 = vrot.slane %v6011_v25, %v5638_v6  ;;  %v1600_v55 = vrot.slane %v6011_v25, %v5641_v60 }
 0x314   :  { %v2924_v3 = vcombine.low %v2916_v26, %v2923_v9  ;;  %v2467_v61 = vcombine.low %v2445_v37, %v2452_v59  ;;  %v6193_v13 = vadd.s32 %v5730_v0, %v889_v27  ;;  %v1604_v51 = vrot.slane %v6011_v25, %v5644_v47  ;;  %v916_v27 = vpop.xlane.xlu1 %915 }
 0x315   :  { %v2468_v46 = vcombine.low %v2459_v38, %v2466_v36  ;;  %v6198_v40 = vadd.s32 %v5732_v49, %v903_v17  ;;  %v1608_v33 = vrot.slane %v6011_v25, %v5649_v14  ;;  %v1612_v1 = vrot.slane %v6011_v25, %v5660_v54 }
 0x316   :  { %3571 = vperm.xlu0 %4861, %v2924_v3   ;;  %v2475_v58 = vrot.slane %v2467_v61, %v5679_v18  ;;  %v1616_v0 = vrot.slane %v6011_v25, %v5665_v19  ;;  %v1620_v8 = vrot.slane %v6011_v25, %v5668_v24  ;;  %v1624_v35 = vrot.slane %v6011_v25, %v5671_v48 }
 0x317   :  { %v2482_v49 = vrot.slane %v2468_v46, %v5679_v18  ;;  %v2974_v11 = vcombine.low %v1596_v4, %v1600_v55  ;;  %v2975_v5 = vcombine.low %v1604_v51, %v1608_v33  ;;  %v1340_v12 = vrot.slane %v5864_v56, %v5638_v6 }
 0x318   :  { %v2976_v62 = vcombine.low %v1612_v1, %v1616_v0  ;;  %v2977_v29 = vcombine.low %v1620_v8, %v1624_v35  ;;  %v1344_v16 = vrot.slane %v5864_v56, %v5641_v60  ;;  %v1348_v57 = vrot.slane %v5864_v56, %v5644_v47 }
 0x319   :  { %v2483_v45 = vcombine.low %v2475_v58, %v2482_v49  ;;  %v2984_v7 = vrot.slane %v2974_v11, %v5679_v18  ;;  %v2991_v25 = vrot.slane %v2975_v5, %v5679_v18  ;;  %v1352_v34 = vrot.slane %v5864_v56, %v5649_v14 }
 0x31a   :  { %v2998_v22 = vrot.slane %v2976_v62, %v5679_v18  ;;  %v3005_v41 = vrot.slane %v2977_v29, %v5679_v18  ;;  %v1356_v26 = vrot.slane %v5864_v56, %v5660_v54  ;;  %v1360_v32 = vrot.slane %v5864_v56, %v5665_v19 }
 0x31b   :  { %3544 = vperm.xlu1 %4860, %v2483_v45   ;;  %v3006_v37 = vcombine.low %v2984_v7, %v2991_v25  ;;  %v1364_v9 = vrot.slane %v5864_v56, %v5668_v24  ;;  %v1368_v59 = vrot.slane %v5864_v56, %v5671_v48  ;;  %v2582_v38 = vcombine.low %v1340_v12, %v1344_v16 }
 0x31c   :  { %v3007_v36 = vcombine.low %v2998_v22, %v3005_v41  ;;  %v2583_v17 = vcombine.low %v1348_v57, %v1352_v34  ;;  %v2584_v4 = vcombine.low %v1356_v26, %v1360_v32  ;;  %vm3844_vm11 = vcmp.eq.s32.totalorder %v6774_v42, %v6137_v52 }
 0x31d   :  { %v3014_v55 = vrot.slane %v3006_v37, %v5679_v18  ;;  %v2585_v3 = vcombine.low %v1364_v9, %v1368_v59  ;;  %v2592_v61 = vrot.slane %v2582_v38, %v5679_v18  ;;  %4841 = vmatmul.mubr.msk.f32.gmra.mxu1 %vm3844_vm11, %v5001_v23  ;;  %vm3845_vm12 = vcmp.eq.s32.totalorder %v6774_v42, %v6142_v21 }
 0x31e   :  { %v3021_v56 = vrot.slane %v3007_v36, %v5679_v18  ;;  %v2599_v51 = vrot.slane %v2583_v17, %v5679_v18  ;;  %v2606_v46 = vrot.slane %v2584_v4, %v5679_v18  ;;  %4843 = vmatprep.mubr.msk.f32.mxu1 %vm3845_vm12, %v5001_v23  ;;  %v917_v33 = vcvt.f32.s32 %v916_v27 }
 0x31f   :  { %v2613_v1 = vrot.slane %v2585_v3, %v5679_v18  ;;  %v1660_v58 = vrot.slane %v6045_v63, %v5638_v6  ;;  %v1664_v0 = vrot.slane %v6045_v63, %v5641_v60  ;;  %v1668_v8 = vrot.slane %v6045_v63, %v5644_v47 }
 0x320   :  { %v3022_v35 = vcombine.low %v3014_v55, %v3021_v56  ;;  %v2614_v49 = vcombine.low %v2592_v61, %v2599_v51  ;;  %v6251_v11 = vadd.s32 %v5748_v53, %v917_v33  ;;  %v1672_v5 = vrot.slane %v6045_v63, %v5649_v14 }
 0x321   :  { %v2615_v12 = vcombine.low %v2606_v46, %v2613_v1  ;;  %v1676_v62 = vrot.slane %v6045_v63, %v5660_v54  ;;  %v1680_v29 = vrot.slane %v6045_v63, %v5665_v19  ;;  %v1684_v16 = vrot.slane %v6045_v63, %v5668_v24 }
 0x322   :  { %3577 = vperm.xlu0 %4861, %v3022_v35   ;;  %v2622_v57 = vrot.slane %v2614_v49, %v5679_v18  ;;  %v1688_v53 = vrot.slane %v6045_v63, %v5671_v48  ;;  %v3072_v45 = vcombine.low %v1660_v58, %v1664_v0  ;;  %v3073_v7 = vcombine.low %v1668_v8, %v1672_v5 }
 0x323   :  { %v2629_v25 = vrot.slane %v2615_v12, %v5679_v18  ;;  %v3074_v34 = vcombine.low %v1676_v62, %v1680_v29  ;;  %v1308_v22 = vrot.slane %v5841_v43, %v5638_v6  ;;  %v1312_v41 = vrot.slane %v5841_v43, %v5641_v60 }
 0x324   :  { %v3075_v26 = vcombine.low %v1684_v16, %v1688_v53  ;;  %v3082_v32 = vrot.slane %v3072_v45, %v5679_v18  ;;  %v3089_v37 = vrot.slane %v3073_v7, %v5679_v18  ;;  %v1316_v9 = vrot.slane %v5841_v43, %v5644_v47 }
 0x325   :  { %v2630_v63 = vcombine.low %v2622_v57, %v2629_v25  ;;  %v3096_v59 = vrot.slane %v3074_v34, %v5679_v18  ;;  %v1320_v38 = vrot.slane %v5841_v43, %v5649_v14  ;;  %v1324_v27 = vrot.slane %v5841_v43, %v5660_v54 }
 0x326   :  { %v3103_v36 = vrot.slane %v3075_v26, %v5679_v18  ;;  %v3104_v17 = vcombine.low %v3082_v32, %v3089_v37  ;;  %v1328_v4 = vrot.slane %v5841_v43, %v5665_v19  ;;  %v1332_v55 = vrot.slane %v5841_v43, %v5668_v24 }
 0x327   :  { %3553 = vperm.xlu1 %4860, %v2630_v63   ;;  %v1336_v3 = vrot.slane %v5841_v43, %v5671_v48  ;;  %v2533_v61 = vcombine.low %v1308_v22, %v1312_v41  ;;  %v2534_v56 = vcombine.low %v1316_v9, %v1320_v38  ;;  %vm3846_vm13 = vcmp.eq.s32.totalorder %v6774_v42, %v6193_v13 }
 0x328   :  { %v3105_v51 = vcombine.low %v3096_v59, %v3103_v36  ;;  %v3112_v46 = vrot.slane %v3104_v17, %v5679_v18  ;;  %v2535_v33 = vcombine.low %v1324_v27, %v1328_v4  ;;  %4844 = vmatmul.mubr.msk.f32.gmra.mxu1 %vm3846_vm13, %v5001_v23  ;;  %vm3847_vm14 = vcmp.eq.s32.totalorder %v6774_v42, %v6198_v40 }
 0x329   :  { %v2536_v1 = vcombine.low %v1332_v55, %v1336_v3  ;;  %v2543_v58 = vrot.slane %v2533_v61, %v5679_v18  ;;  %v2550_v0 = vrot.slane %v2534_v56, %v5679_v18  ;;  %4846 = vmatprep.mubr.msk.f32.mxu1 %vm3847_vm14, %v5001_v23  ;;  %v1724_v43 = vrot.slane %v6076_v2, %v5638_v6 }
 0x32a   :  { %v3119_v8 = vrot.slane %v3105_v51, %v5679_v18  ;;  %v2557_v35 = vrot.slane %v2535_v33, %v5679_v18  ;;  %v1728_v49 = vrot.slane %v6076_v2, %v5641_v60  ;;  %v1732_v5 = vrot.slane %v6076_v2, %v5644_v47 }
 0x32b   :  { %v2564_v12 = vrot.slane %v2536_v1, %v5679_v18  ;;  %v2565_v62 = vcombine.low %v2543_v58, %v2550_v0  ;;  %v1736_v29 = vrot.slane %v6076_v2, %v5649_v14  ;;  %v1740_v16 = vrot.slane %v6076_v2, %v5660_v54 }
 0x32c   :  { %v3120_v57 = vcombine.low %v3112_v46, %v3119_v8  ;;  %v1744_v53 = vrot.slane %v6076_v2, %v5665_v19  ;;  %v1748_v45 = vrot.slane %v6076_v2, %v5668_v24  ;;  %v1752_v7 = vrot.slane %v6076_v2, %v5671_v48 }
 0x32d   :  { %v2566_v25 = vcombine.low %v2557_v35, %v2564_v12  ;;  %v2573_v34 = vrot.slane %v2565_v62, %v5679_v18  ;;  %v3170_v22 = vcombine.low %v1724_v43, %v1728_v49  ;;  %v3171_v41 = vcombine.low %v1732_v5, %v1736_v29 }
 0x32e   :  { %3583 = vperm.xlu0 %4861, %v3120_v57   ;;  %v3172_v26 = vcombine.low %v1740_v16, %v1744_v53  ;;  %v3173_v32 = vcombine.low %v1748_v45, %v1752_v7  ;;  %v1436_v37 = vrot.slane %v5894_v39, %v5638_v6  ;;  %v1440_v9 = vrot.slane %v5894_v39, %v5641_v60 }
 0x32f   :  { %v2580_v63 = vrot.slane %v2566_v25, %v5679_v18  ;;  %v3180_v59 = vrot.slane %v3170_v22, %v5679_v18  ;;  %v3187_v2 = vrot.slane %v3171_v41, %v5679_v18  ;;  %v1444_v38 = vrot.slane %v5894_v39, %v5644_v47 }
 0x330   :  { %v3194_v27 = vrot.slane %v3172_v26, %v5679_v18  ;;  %v3201_v36 = vrot.slane %v3173_v32, %v5679_v18  ;;  %v1448_v17 = vrot.slane %v5894_v39, %v5649_v14  ;;  %v1452_v4 = vrot.slane %v5894_v39, %v5660_v54 }
 0x331   :  { %v2581_v55 = vcombine.low %v2573_v34, %v2580_v63  ;;  %v3202_v3 = vcombine.low %v3180_v59, %v3187_v2  ;;  %v1456_v61 = vrot.slane %v5894_v39, %v5665_v19  ;;  %v1460_v56 = vrot.slane %v5894_v39, %v5668_v24 }
 0x332   :  { %v3203_v51 = vcombine.low %v3194_v27, %v3201_v36  ;;  %v1464_v46 = vrot.slane %v5894_v39, %v5671_v48  ;;  %v2729_v33 = vcombine.low %v1436_v37, %v1440_v9  ;;  %v2730_v1 = vcombine.low %v1444_v38, %v1448_v17 }
 0x333   :  { %3550 = vperm.xlu1 %4860, %v2581_v55   ;;  %v3210_v58 = vrot.slane %v3202_v3, %v5679_v18  ;;  %v2731_v0 = vcombine.low %v1452_v4, %v1456_v61  ;;  %vm3848_vm15 = vcmp.eq.s32.totalorder %v6774_v42, %v6251_v11  ;;  %v1788_v43 = vrot.slane %v6137_v52, %v5638_v6 }
 0x334   :  { %v3217_v8 = vrot.slane %v3203_v51, %v5679_v18  ;;  %v2732_v35 = vcombine.low %v1460_v56, %v1464_v46  ;;  %v2739_v49 = vrot.slane %v2729_v33, %v5679_v18  ;;  %v2746_v5 = vrot.slane %v2730_v1, %v5679_v18  ;;  %4847 = vmatmul.mubr.msk.f32.gmra.mxu1 %vm3848_vm15, %v5001_v23 }
 0x335   :  { %v2753_v39 = vrot.slane %v2731_v0, %v5679_v18  ;;  %v1792_v12 = vrot.slane %v6137_v52, %v5641_v60  ;;  %v1796_v62 = vrot.slane %v6137_v52, %v5644_v47  ;;  %v1800_v29 = vrot.slane %v6137_v52, %v5649_v14 }
 0x336   :  { %v3218_v16 = vcombine.low %v3210_v58, %v3217_v8  ;;  %v2760_v57 = vrot.slane %v2732_v35, %v5679_v18  ;;  %v2761_v53 = vcombine.low %v2739_v49, %v2746_v5  ;;  %v1804_v45 = vrot.slane %v6137_v52, %v5660_v54 }
 0x337   :  { %v1808_v23 = vrot.slane %v6137_v52, %v5665_v19  ;;  %v1812_v7 = vrot.slane %v6137_v52, %v5668_v24  ;;  %v1816_v25 = vrot.slane %v6137_v52, %v5671_v48  ;;  %v3268_v34 = vcombine.low %v1788_v43, %v1792_v12 }
 0x338   :  { %3589 = vperm.xlu0 %4861, %v3218_v16   ;;  %v2762_v22 = vcombine.low %v2753_v39, %v2760_v57  ;;  %v2769_v41 = vrot.slane %v2761_v53, %v5679_v18  ;;  %v3269_v26 = vcombine.low %v1796_v62, %v1800_v29  ;;  %v1500_v32 = vrot.slane %v5924_v30, %v5638_v6 }
 0x339   :  { %v3270_v37 = vcombine.low %v1804_v45, %v1808_v23  ;;  %v3271_v9 = vcombine.low %v1812_v7, %v1816_v25  ;;  %v3278_v63 = vrot.slane %v3268_v34, %v5679_v18  ;;  %v1504_v59 = vrot.slane %v5924_v30, %v5641_v60 }
 0x33a   :  { %v2776_v2 = vrot.slane %v2762_v22, %v5679_v18  ;;  %v3285_v52 = vrot.slane %v3269_v26, %v5679_v18  ;;  %v1508_v38 = vrot.slane %v5924_v30, %v5644_v47  ;;  %v1512_v27 = vrot.slane %v5924_v30, %v5649_v14 }
 0x33b   :  { %v3292_v36 = vrot.slane %v3270_v37, %v5679_v18  ;;  %v3299_v17 = vrot.slane %v3271_v9, %v5679_v18  ;;  %v1516_v4 = vrot.slane %v5924_v30, %v5660_v54  ;;  %v1520_v55 = vrot.slane %v5924_v30, %v5665_v19 }
 0x33c   :  { %v2777_v3 = vcombine.low %v2769_v41, %v2776_v2  ;;  %v3300_v61 = vcombine.low %v3278_v63, %v3285_v52  ;;  %v1524_v56 = vrot.slane %v5924_v30, %v5668_v24  ;;  %v1528_v51 = vrot.slane %v5924_v30, %v5671_v48 }
 0x33d   :  { %v3301_v46 = vcombine.low %v3292_v36, %v3299_v17  ;;  %v2827_v33 = vcombine.low %v1500_v32, %v1504_v59  ;;  %v2828_v1 = vcombine.low %v1508_v38, %v1512_v27  ;;  %v2829_v58 = vcombine.low %v1516_v4, %v1520_v55 }
 0x33e   :  { %3562 = vperm.xlu1 %4860, %v2777_v3   ;;  %v3308_v0 = vrot.slane %v3300_v61, %v5679_v18  ;;  %v2830_v43 = vcombine.low %v1524_v56, %v1528_v51  ;;  %v1564_v8 = vrot.slane %v5982_v50, %v5638_v6  ;;  %v1568_v35 = vrot.slane %v5982_v50, %v5641_v60 }
 0x33f   :  { %v3315_v49 = vrot.slane %v3301_v46, %v5679_v18  ;;  %v2837_v5 = vrot.slane %v2827_v33, %v5679_v18  ;;  %v2844_v30 = vrot.slane %v2828_v1, %v5679_v18  ;;  %v2851_v39 = vrot.slane %v2829_v58, %v5679_v18 }
 0x340   :  { %v2858_v12 = vrot.slane %v2830_v43, %v5679_v18  ;;  %v1572_v62 = vrot.slane %v5982_v50, %v5644_v47  ;;  %v1576_v29 = vrot.slane %v5982_v50, %v5649_v14  ;;  %v1580_v16 = vrot.slane %v5982_v50, %v5660_v54 }
 0x341   :  { %v3316_v57 = vcombine.low %v3308_v0, %v3315_v49  ;;  %v2859_v53 = vcombine.low %v2837_v5, %v2844_v30  ;;  %v1584_v45 = vrot.slane %v5982_v50, %v5665_v19  ;;  %v1588_v23 = vrot.slane %v5982_v50, %v5668_v24 }
 0x342   :  { %v2860_v7 = vcombine.low %v2851_v39, %v2858_v12  ;;  %v1592_v25 = vrot.slane %v5982_v50, %v5671_v48  ;;  %v2925_v34 = vcombine.low %v1564_v8, %v1568_v35  ;;  %v2926_v22 = vcombine.low %v1572_v62, %v1576_v29 }
 0x343   :  { %3595 = vperm.xlu0 %4861, %v3316_v57   ;;  %v2867_v41 = vrot.slane %v2859_v53, %v5679_v18  ;;  %v2927_v26 = vcombine.low %v1580_v16, %v1584_v45  ;;  %v1756_v32 = vrot.slane %v6082_v15, %v5638_v6  ;;  %v1760_v37 = vrot.slane %v6082_v15, %v5641_v60 }
 0x344   :  { %v2874_v9 = vrot.slane %v2860_v7, %v5679_v18  ;;  %v2928_v63 = vcombine.low %v1588_v23, %v1592_v25  ;;  %v2935_v59 = vrot.slane %v2925_v34, %v5679_v18  ;;  %v2942_v2 = vrot.slane %v2926_v22, %v5679_v18 }
 0x345   :  { %v2949_v50 = vrot.slane %v2927_v26, %v5679_v18  ;;  %v1764_v52 = vrot.slane %v6082_v15, %v5644_v47  ;;  %v1768_v38 = vrot.slane %v6082_v15, %v5649_v14  ;;  %v1772_v27 = vrot.slane %v6082_v15, %v5660_v54 }
 0x346   :  { %v2875_v36 = vcombine.low %v2867_v41, %v2874_v9  ;;  %v2956_v17 = vrot.slane %v2928_v63, %v5679_v18  ;;  %v2957_v4 = vcombine.low %v2935_v59, %v2942_v2  ;;  %v1776_v55 = vrot.slane %v6082_v15, %v5665_v19 }
 0x347   :  { %v1780_v3 = vrot.slane %v6082_v15, %v5668_v24  ;;  %v1784_v61 = vrot.slane %v6082_v15, %v5671_v48  ;;  %v3219_v56 = vcombine.low %v1756_v32, %v1760_v37  ;;  %v3220_v51 = vcombine.low %v1764_v52, %v1768_v38 }
 0x348   :  { %3568 = vperm.xlu1 %4860, %v2875_v36   ;;  %v2958_v46 = vcombine.low %v2949_v50, %v2956_v17  ;;  %v2965_v33 = vrot.slane %v2957_v4, %v5679_v18  ;;  %v3221_v1 = vcombine.low %v1772_v27, %v1776_v55  ;;  %v1628_v58 = vrot.slane %v6016_v28, %v5638_v6 }
 0x349   :  { %v3222_v0 = vcombine.low %v1780_v3, %v1784_v61  ;;  %v3229_v43 = vrot.slane %v3219_v56, %v5679_v18  ;;  %v3236_v8 = vrot.slane %v3220_v51, %v5679_v18  ;;  %v1632_v35 = vrot.slane %v6016_v28, %v5641_v60 }
 0x34a   :  { %v2972_v15 = vrot.slane %v2958_v46, %v5679_v18  ;;  %v3243_v49 = vrot.slane %v3221_v1, %v5679_v18  ;;  %v1636_v5 = vrot.slane %v6016_v28, %v5644_v47  ;;  %v1640_v30 = vrot.slane %v6016_v28, %v5649_v14 }
 0x34b   :  { %v3250_v39 = vrot.slane %v3222_v0, %v5679_v18  ;;  %v3251_v12 = vcombine.low %v3229_v43, %v3236_v8  ;;  %v1644_v62 = vrot.slane %v6016_v28, %v5660_v54  ;;  %v1648_v29 = vrot.slane %v6016_v28, %v5665_v19 }
 0x34c   :  { %v2973_v16 = vcombine.low %v2965_v33, %v2972_v15  ;;  %v1652_v57 = vrot.slane %v6016_v28, %v5668_v24  ;;  %v1656_v53 = vrot.slane %v6016_v28, %v5671_v48  ;;  %v3023_v45 = vcombine.low %v1628_v58, %v1632_v35 }
 0x34d   :  { %v3252_v23 = vcombine.low %v3243_v49, %v3250_v39  ;;  %v3259_v7 = vrot.slane %v3251_v12, %v5679_v18  ;;  %v3024_v25 = vcombine.low %v1636_v5, %v1640_v30  ;;  %v3025_v34 = vcombine.low %v1644_v62, %v1648_v29 }
 0x34e   :  { %3574 = vperm.xlu1 %4860, %v2973_v16   ;;  %v3026_v22 = vcombine.low %v1652_v57, %v1656_v53  ;;  %v3033_v41 = vrot.slane %v3023_v45, %v5679_v18  ;;  %v1852_v26 = vrot.slane %v6193_v13, %v5638_v6  ;;  %v1856_v32 = vrot.slane %v6193_v13, %v5641_v60 }
 0x34f   :  { %v3266_v37 = vrot.slane %v3252_v23, %v5679_v18  ;;  %v3040_v28 = vrot.slane %v3024_v25, %v5679_v18  ;;  %v3047_v9 = vrot.slane %v3025_v34, %v5679_v18  ;;  %v1860_v63 = vrot.slane %v6193_v13, %v5644_v47 }
 0x350   :  { %v3054_v59 = vrot.slane %v3026_v22, %v5679_v18  ;;  %v1864_v2 = vrot.slane %v6193_v13, %v5649_v14  ;;  %v1868_v50 = vrot.slane %v6193_v13, %v5660_v54  ;;  %v1872_v52 = vrot.slane %v6193_v13, %v5665_v19 }
 0x351   :  { %v3267_v38 = vcombine.low %v3259_v7, %v3266_v37  ;;  %v3055_v27 = vcombine.low %v3033_v41, %v3040_v28  ;;  %v1876_v36 = vrot.slane %v6193_v13, %v5668_v24  ;;  %v1880_v17 = vrot.slane %v6193_v13, %v5671_v48 }
 0x352   :  { %v3056_v4 = vcombine.low %v3047_v9, %v3054_v59  ;;  %v3366_v55 = vcombine.low %v1852_v26, %v1856_v32  ;;  %v3367_v3 = vcombine.low %v1860_v63, %v1864_v2  ;;  %v3368_v61 = vcombine.low %v1868_v50, %v1872_v52 }
 0x353   :  { %3592 = vperm.xlu0 %4861, %v3267_v38   ;;  %v3063_v56 = vrot.slane %v3055_v27, %v5679_v18  ;;  %v3369_v51 = vcombine.low %v1876_v36, %v1880_v17  ;;  %v1692_v46 = vrot.slane %v6050_v20, %v5638_v6  ;;  %v1696_v33 = vrot.slane %v6050_v20, %v5641_v60 }
 0x354   :  { %v3070_v1 = vrot.slane %v3056_v4, %v5679_v18  ;;  %v3376_v58 = vrot.slane %v3366_v55, %v5679_v18  ;;  %v3383_v13 = vrot.slane %v3367_v3, %v5679_v18  ;;  %v3390_v0 = vrot.slane %v3368_v61, %v5679_v18 }
 0x355   :  { %v3397_v43 = vrot.slane %v3369_v51, %v5679_v18  ;;  %v1700_v8 = vrot.slane %v6050_v20, %v5644_v47  ;;  %v1704_v35 = vrot.slane %v6050_v20, %v5649_v14  ;;  %v1708_v15 = vrot.slane %v6050_v20, %v5660_v54 }
 0x356   :  { %v3071_v49 = vcombine.low %v3063_v56, %v3070_v1  ;;  %v3398_v5 = vcombine.low %v3376_v58, %v3383_v13  ;;  %v1712_v30 = vrot.slane %v6050_v20, %v5665_v19  ;;  %v1716_v39 = vrot.slane %v6050_v20, %v5668_v24 }
 0x357   :  { %v3399_v12 = vcombine.low %v3390_v0, %v3397_v43  ;;  %v1720_v62 = vrot.slane %v6050_v20, %v5671_v48  ;;  %v3121_v29 = vcombine.low %v1692_v46, %v1696_v33  ;;  %v3122_v16 = vcombine.low %v1700_v8, %v1704_v35 }
 0x358   :  { %3580 = vperm.xlu1 %4860, %v3071_v49   ;;  %v3406_v57 = vrot.slane %v3398_v5, %v5679_v18  ;;  %v3123_v53 = vcombine.low %v1708_v15, %v1712_v30  ;;  %v1820_v45 = vrot.slane %v6142_v21, %v5638_v6  ;;  %v1824_v23 = vrot.slane %v6142_v21, %v5641_v60 }
 0x359   :  { %v3413_v7 = vrot.slane %v3399_v12, %v5679_v18  ;;  %v3124_v25 = vcombine.low %v1716_v39, %v1720_v62  ;;  %v3131_v34 = vrot.slane %v3121_v29, %v5679_v18  ;;  %v3138_v22 = vrot.slane %v3122_v16, %v5679_v18 }
 0x35a   :  { %v3145_v20 = vrot.slane %v3123_v53, %v5679_v18  ;;  %v1828_v41 = vrot.slane %v6142_v21, %v5644_v47  ;;  %v1832_v26 = vrot.slane %v6142_v21, %v5649_v14  ;;  %v1836_v32 = vrot.slane %v6142_v21, %v5660_v54 }
 0x35b   :  { %v3414_v37 = vcombine.low %v3406_v57, %v3413_v7  ;;  %v3152_v28 = vrot.slane %v3124_v25, %v5679_v18  ;;  %v3153_v9 = vcombine.low %v3131_v34, %v3138_v22  ;;  %v1840_v63 = vrot.slane %v6142_v21, %v5665_v19 }
 0x35c   :  { %v1844_v59 = vrot.slane %v6142_v21, %v5668_v24  ;;  %v1848_v2 = vrot.slane %v6142_v21, %v5671_v48  ;;  %v3317_v50 = vcombine.low %v1820_v45, %v1824_v23  ;;  %v3318_v52 = vcombine.low %v1828_v41, %v1832_v26 }
 0x35d   :  { %3601 = vperm.xlu0 %4861, %v3414_v37   ;;  %v3154_v38 = vcombine.low %v3145_v20, %v3152_v28  ;;  %v3161_v27 = vrot.slane %v3153_v9, %v5679_v18  ;;  %v3319_v36 = vcombine.low %v1836_v32, %v1840_v63  ;;  %v1372_v17 = vrot.slane %v5867_v44, %v5638_v6 }
 0x35e   :  { %v3320_v4 = vcombine.low %v1844_v59, %v1848_v2  ;;  %v3327_v55 = vrot.slane %v3317_v50, %v5679_v18  ;;  %v3334_v3 = vrot.slane %v3318_v52, %v5679_v18  ;;  %v1376_v61 = vrot.slane %v5867_v44, %v5641_v60 }
 0x35f   :  { %v3168_v21 = vrot.slane %v3154_v38, %v5679_v18  ;;  %v3341_v56 = vrot.slane %v3319_v36, %v5679_v18  ;;  %v1380_v51 = vrot.slane %v5867_v44, %v5644_v47  ;;  %v1384_v46 = vrot.slane %v5867_v44, %v5649_v14 }
 0x360   :  { %v3348_v33 = vrot.slane %v3320_v4, %v5679_v18  ;;  %v3349_v1 = vcombine.low %v3327_v55, %v3334_v3  ;;  %v1388_v58 = vrot.slane %v5867_v44, %v5660_v54  ;;  %v1392_v13 = vrot.slane %v5867_v44, %v5665_v19 }
 0x361   :  { %v3169_v0 = vcombine.low %v3161_v27, %v3168_v21  ;;  %v1396_v43 = vrot.slane %v5867_v44, %v5668_v24  ;;  %v1400_v8 = vrot.slane %v5867_v44, %v5671_v48  ;;  %v2631_v35 = vcombine.low %v1372_v17, %v1376_v61 }
 0x362   :  { %v3350_v15 = vcombine.low %v3341_v56, %v3348_v33  ;;  %v3357_v49 = vrot.slane %v3349_v1, %v5679_v18  ;;  %v2632_v5 = vcombine.low %v1380_v51, %v1384_v46  ;;  %v2633_v30 = vcombine.low %v1388_v58, %v1392_v13 }
 0x363   :  { %3586 = vperm.xlu1 %4860, %v3169_v0   ;;  %v2634_v39 = vcombine.low %v1396_v43, %v1400_v8  ;;  %v2641_v12 = vrot.slane %v2631_v35, %v5679_v18  ;;  %v1884_v62 = vrot.slane %v6198_v40, %v5638_v6  ;;  %v1888_v29 = vrot.slane %v6198_v40, %v5641_v60 }
 0x364   :  { %v3364_v16 = vrot.slane %v3350_v15, %v5679_v18  ;;  %v2648_v44 = vrot.slane %v2632_v5, %v5679_v18  ;;  %v2655_v57 = vrot.slane %v2633_v30, %v5679_v18  ;;  %v1892_v53 = vrot.slane %v6198_v40, %v5644_v47 }
 0x365   :  { %v2662_v45 = vrot.slane %v2634_v39, %v5679_v18  ;;  %v1896_v23 = vrot.slane %v6198_v40, %v5649_v14  ;;  %v1900_v7 = vrot.slane %v6198_v40, %v5660_v54  ;;  %v1904_v25 = vrot.slane %v6198_v40, %v5665_v19 }
 0x366   :  { %v3365_v34 = vcombine.low %v3357_v49, %v3364_v16  ;;  %v2663_v22 = vcombine.low %v2641_v12, %v2648_v44  ;;  %v1908_v20 = vrot.slane %v6198_v40, %v5668_v24  ;;  %v1912_v41 = vrot.slane %v6198_v40, %v5671_v48 }
 0x367   :  { %v2664_v26 = vcombine.low %v2655_v57, %v2662_v45  ;;  %v3415_v32 = vcombine.low %v1884_v62, %v1888_v29  ;;  %v3416_v37 = vcombine.low %v1892_v53, %v1896_v23  ;;  %v3417_v28 = vcombine.low %v1900_v7, %v1904_v25 }
 0x368   :  { %3598 = vperm.xlu0 %4861, %v3365_v34   ;;  %v2671_v9 = vrot.slane %v2663_v22, %v5679_v18  ;;  %v3418_v63 = vcombine.low %v1908_v20, %v1912_v41  ;;  %v1404_v59 = vrot.slane %v5884_v10, %v5638_v6  ;;  %v1408_v2 = vrot.slane %v5884_v10, %v5641_v60 }
 0x369   :  { %v2678_v50 = vrot.slane %v2664_v26, %v5679_v18  ;;  %v3425_v52 = vrot.slane %v3415_v32, %v5679_v18  ;;  %v3432_v40 = vrot.slane %v3416_v37, %v5679_v18  ;;  %v3439_v38 = vrot.slane %v3417_v28, %v5679_v18  ;;  %v6610_v26 = vpop.permute.xlu1 %3517  ;;  %v4862_v28 = vld [vmem:[#allocation2 + $0x8] sm:$0xff] }
 0x36a   :  { %v3446_v27 = vrot.slane %v3418_v63, %v5679_v18  ;;  %v1412_v36 = vrot.slane %v5884_v10, %v5644_v47  ;;  %v1416_v17 = vrot.slane %v5884_v10, %v5649_v14  ;;  %v1420_v4 = vrot.slane %v5884_v10, %v5660_v54  ;;  %v4863_v63 = vld [vmem:[#allocation2] sm:$0xff] }
 0x36b   :  { %v2679_v55 = vcombine.low %v2671_v9, %v2678_v50  ;;  %v3447_v3 = vcombine.low %v3425_v52, %v3432_v40  ;;  %v1424_v61 = vrot.slane %v5884_v10, %v5665_v19  ;;  %v1428_v21 = vrot.slane %v5884_v10, %v5668_v24  ;;  %v4864_v50 = vld [vmem:[#allocation2 + $0x10] sm:$0xff] }
 0x36c   :  { %v3448_v56 = vcombine.low %v3439_v38, %v3446_v27  ;;  %v1432_v51 = vrot.slane %v5884_v10, %v5671_v48  ;;  %v2680_v46 = vcombine.low %v1404_v59, %v1408_v2  ;;  %v2681_v33 = vcombine.low %v1412_v36, %v1416_v17  ;;  %v4865_v36 = vld [vmem:[#allocation2 + $0x18] sm:$0xff] }
 0x36d   :  { %3556 = vperm.xlu1 %4860, %v2679_v55   ;;  %v3455_v1 = vrot.slane %v3447_v3, %v5679_v18  ;;  %v2682_v58 = vcombine.low %v1420_v4, %v1424_v61  ;;  %v1916_v13 = vrot.slane %v6251_v11, %v5638_v6  ;;  %v1920_v0 = vrot.slane %v6251_v11, %v5641_v60  ;;  %v6612_v40 = vpop.permute.xlu1 %3523 }
 0x36e   :  { %v3462_v43 = vrot.slane %v3448_v56, %v5679_v18  ;;  %v2683_v8 = vcombine.low %v1428_v21, %v1432_v51  ;;  %v2690_v35 = vrot.slane %v2680_v46, %v5679_v18  ;;  %v2697_v15 = vrot.slane %v2681_v33, %v5679_v18 }
 0x36f   :  { %v2704_v10 = vrot.slane %v2682_v58, %v5679_v18  ;;  %v1924_v49 = vrot.slane %v6251_v11, %v5644_v47  ;;  %v1928_v5 = vrot.slane %v6251_v11, %v5649_v14  ;;  %v1932_v6 = vrot.slane %v6251_v11, %v5660_v54 }
 0x370   :  { %v3463_v30 = vcombine.low %v3455_v1, %v3462_v43  ;;  %v2711_v60 = vrot.slane %v2683_v8, %v5679_v18  ;;  %v2712_v39 = vcombine.low %v2690_v35, %v2697_v15  ;;  %v1936_v12 = vrot.slane %v6251_v11, %v5665_v19 }
 0x371   :  { %v1940_v62 = vrot.slane %v6251_v11, %v5668_v24  ;;  %v1944_v29 = vrot.slane %v6251_v11, %v5671_v48  ;;  %v3464_v47 = vcombine.low %v1916_v13, %v1920_v0  ;;  %v3465_v16 = vcombine.low %v1924_v49, %v1928_v5  ;;  %v6614_v46 = vpop.permute.xlu1 %3520 }
 0x372   :  { %3604 = vperm.xlu0 %4861, %v3463_v30   ;;  %v2713_v14 = vcombine.low %v2704_v10, %v2711_v60  ;;  %v2720_v44 = vrot.slane %v2712_v39, %v5679_v18  ;;  %v3466_v54 = vcombine.low %v1932_v6, %v1936_v12  ;;  %vm3618_vm0 = vcmask 130112  }
 0x373   :  { %v3467_v57 = vcombine.low %v1940_v62, %v1944_v29  ;;  %v3474_v53 = vrot.slane %v3464_v47, %v5679_v18  ;;  %v3481_v45 = vrot.slane %v3465_v16, %v5679_v18  ;;  %vm3625_vm1 = vcmask 195712  }
 0x374   :  { %v2727_v19 = vrot.slane %v2713_v14, %v5679_v18  ;;  %v3488_v23 = vrot.slane %v3466_v54, %v5679_v18  ;;  %vm3632_vm2 = vcmask 261312   ;;  %vm3639_vm3 = vcmask 326912  }
 0x375   :  { %v3495_v24 = vrot.slane %v3467_v57, %v5679_v18  ;;  %v3496_v7 = vcombine.low %v3474_v53, %v3481_v45  ;;  %v6616_v43 = vpop.permute.xlu1 %3529  ;;  %v6628_v57 = vpop.permute.xlu0 %3514  ;;  %vm3646_vm4 = vcmask 392512   ;;  %vm3653_vm5 = vcmask 458112  }
 0x376   :  { %v2728_v48 = vcombine.low %v2720_v44, %v2727_v19  ;;  %vm3660_vm6 = vcmask 523712   ;;  %vm3667_vm7 = vcmask 589312   ;;  %vm3674_vm8 = vcmask 654912  }
 0x377   :  { %v3497_v11 = vcombine.low %v3488_v23, %v3495_v24  ;;  %v3504_v25 = vrot.slane %v3496_v7, %v5679_v18  ;;  %vm3681_vm9 = vcmask 720512   ;;  %vm3688_vm10 = vcmask 786112  }
 0x378   :  { %3559 = vperm.xlu1 %4860, %v2728_v48   ;;  %vm3695_vm11 = vcmask 851712   ;;  %vm3702_vm12 = vcmask 917312   ;;  %vm3709_vm13 = vcmask 982912   ;;  %vm3716_vm14 = vcmask 1048512  }
 0x379   :  { %v3511_v34 = vrot.slane %v3497_v11, %v5679_v18  ;;  %v6618_v5 = vpop.permute.xlu1 %3526  ;;  %v6632_v19 = vpop.permute.xlu0 %3541 }
 0x37b   :  { %v3512_v22 = vcombine.low %v3504_v25, %v3511_v34  ;;  %v4803_v20 = vpop.f32.mrf.mxu1 }
 0x37c   :  { %4155 = vst [vmem:[#allocation8 + $0x8] sm:$0xff] %v4803_v20  ;;  %v4187_v9 = vsub.f32 %v4803_v20, %v4862_v28  ;;  %v3620_v28 = vadd.s32 4294967280, %v6774_v42 }
 0x37d   :  { %3607 = vperm.xlu0 %4861, %v3512_v22   ;;  %v3995_v41 = vpop.f32.mrf.mxu1  ;;  %v6620_v39 = vpop.permute.xlu1 %3535 }
 0x37e   :  { %4154 = vst [vmem:[#allocation8] sm:$0xff] %v3995_v41  ;;  %v4186_v59 = vsub.f32 %v3995_v41, %v4863_v63  ;;  %v4414_v38 = vmul.f32 %v4187_v9, %v4187_v9  ;;  %v3613_v9 = vadd.s32 4294967288, %v6774_v42 }
 0x37f   :  { %v4806_v32 = vpop.f32.mrf.mxu1 }
 0x380   :  { %4157 = vst [vmem:[#allocation8 + $0x18] sm:$0xff] %v4806_v32  ;;  %v4413_v27 = vmul.f32 %v4186_v59, %v4186_v59  ;;  %v4189_v17 = vsub.f32 %v4806_v32, %v4865_v36  ;;  %v3611_v59 = vsub.s32 %v6774_v42, %v5618_v31  ;;  %v3616_v36 = vsub.s32 %v3613_v9, %v5618_v31 }
 0x381   :  { %v4005_v37 = vpop.f32.mrf.mxu1  ;;  %v6622_v12 = vpop.permute.xlu1 %3532 }
 0x382   :  { %4156 = vst [vmem:[#allocation8 + $0x10] sm:$0xff] %v4005_v37  ;;  %v4188_v52 = vsub.f32 %v4005_v37, %v4864_v50  ;;  %v4445_v3 = vadd.f32 %v4414_v38, %v4413_v27  ;;  %v4416_v21 = vmul.f32 %v4189_v17, %v4189_v17  ;;  %v3634_v38 = vadd.s32 4294967264, %v6774_v42 }
 0x383   :  { %v4809_v2 = vpop.f32.mrf.mxu1  ;;  %v3627_v17 = vadd.s32 4294967272, %v6774_v42 }
 0x384   :  { %4159 = vst [vmem:[#allocation8 + $0x28] sm:$0xff] %v4809_v2  ;;  %v4415_v55 = vmul.f32 %v4188_v52, %v4188_v52  ;;  %v3623_v52 = vsub.s32 %v3620_v28, %v5618_v31 }
 0x385   :  { %v4015_v4 = vpop.f32.mrf.mxu1  ;;  %v6624_v47 = vpop.permute.xlu1 %3538 }
 0x386   :  { %4158 = vst [vmem:[#allocation8 + $0x20] sm:$0xff] %v4015_v4  ;;  %v4446_v56 = vadd.f32 %v4445_v3, %v4415_v55  ;;  %v3566_v48 = vpop.permute.xlu0 %3565 }
 0x387   :  { %v4812_v61 = vpop.f32.mrf.mxu1  ;;  %v3725_v3 = vrot.slane %v3566_v48, %v3616_v36 }
 0x388   :  { %4161 = vst [vmem:[#allocation8 + $0x38] sm:$0xff] %v4812_v61  ;;  %v4447_v33 = vadd.f32 %v4446_v56, %v4416_v21  ;;  %v3637_v61 = vsub.s32 %v3634_v38, %v5618_v31  ;;  %v3648_v21 = vadd.s32 4294967248, %v6774_v42  ;;  %v3630_v56 = vsub.s32 %v3627_v17, %v5618_v31 }
 0x389   :  { %v4025_v51 = vpop.f32.mrf.mxu1 }
 0x38a   :  { %4160 = vst [vmem:[#allocation8 + $0x30] sm:$0xff] %v4025_v51  ;;  %v4476_v58 = vrot.slane %v4447_v33, 4  ;;  %v6626_v44 = vpop.permute.xlu1 %3547  ;;  %v3641_v51 = vadd.s32 4294967256, %v6774_v42 }
 0x38c   :  { %v4815_v1 = vpop.f32.mrf.mxu1  ;;  %v4477_v0 = vadd.f32 %v4476_v58, %v4447_v33  ;;  %v3617_v58 = vrot.slane %v6610_v26, %v3616_v36  ;;  %v3655_v26 = vadd.s32 4294967240, %v6774_v42 }
 0x38d   :  { %4163 = vst [vmem:[#allocation8 + $0x48] sm:$0xff] %v4815_v1 }
 0x38e   :  { %v4035_v13 = vpop.f32.mrf.mxu1  ;;  %v4478_v8 = vrot.slane %v4477_v0, 2 }
 0x38f   :  { %4162 = vst [vmem:[#allocation8 + $0x40] sm:$0xff] %v4035_v13 }
 0x390   :  { %v4479_v15 = vadd.f32 %v4478_v8, %v4477_v0 }
 0x391   :  { %v3572_v25 = vpop.permute.xlu0 %3571 }
 0x392   :  { %v4480_v49 = vrot.slane %v4479_v15, 1 }
 0x393   :  { %v4818_v35 = vpop.f32.mrf.mxu1 }
 0x394   :  { %4165 = vst [vmem:[#allocation8 + $0x58] sm:$0xff] %v4818_v35  ;;  %v4481_v6 = vadd.f32 %v4480_v49, %v4479_v15  ;;  %v3624_v35 = vrot.slane %v6614_v46, %v3623_v52  ;;  %v3735_v15 = vrot.slane %v3572_v25, %v3630_v56  ;;  %v3651_v49 = vsub.s32 %v3648_v21, %v5618_v31 }
 0x395   :  { %v4045_v10 = vpop.f32.mrf.mxu1 }
 0x396   :  { %4164 = vst [vmem:[#allocation8 + $0x50] sm:$0xff] %v4045_v10  ;;  %4482 = vst [vmem:[#allocation11] sm:$0x1] %v4481_v6  ;;  %v6630_v53 = vpop.permute.xlu1 %3544  ;;  %v3612_v10 = vrot.slane %v6628_v57, %v3611_v59  ;;  %v3662_v6 = vadd.s32 4294967232, %v6774_v42 }
 0x398   :  { %v3665_v48 = vsub.s32 %v3662_v6, %v5618_v31  ;;  %v3711_v6 = vadd.s32 4294967176, %v6774_v42 }
 0x399   :  { %v4821_v30 = vpop.f32.mrf.mxu1 }
 0x39a   :  { %4167 = vst [vmem:[#allocation8 + $0x68] sm:$0xff] %v4821_v30  ;;  %v3644_v30 = vsub.s32 %v3641_v51, %v5618_v31 }
 0x39b   :  { %v4055_v60 = vpop.f32.mrf.mxu1 }
 0x39c   :  { %4166 = vst [vmem:[#allocation8 + $0x60] sm:$0xff] %v4055_v60 }
 0x39d   :  { %v3578_v41 = vpop.permute.xlu0 %3577 }
 0x39e   :  { %v3745_v57 = vrot.slane %v3578_v41, %v3644_v30 }
 0x3a2   :  { %v6634_v24 = vpop.permute.xlu1 %3553 }
 0x3a5   :  { %v4824_v62 = vpop.f32.mrf.mxu1 }
 0x3a6   :  { %4169 = vst [vmem:[#allocation8 + $0x78] sm:$0xff] %v4824_v62 }
 0x3a7   :  { %v4065_v29 = vpop.f32.mrf.mxu1 }
 0x3a8   :  { %4168 = vst [vmem:[#allocation8 + $0x70] sm:$0xff] %v4065_v29  ;;  %v3619_v29 = vsel %vm3618_vm0, %v3617_v58, %v3612_v10 }
 0x3a9   :  { %v6638_v37 = vpop.permute.xlu0 %3583 }
 0x3ac   :  { %v4827_v16 = vpop.f32.mrf.mxu1 }
 0x3ad   :  { %4171 = vst [vmem:[#allocation8 + $0x88] sm:$0xff] %v4827_v16 }
 0x3ae   :  { %v4075_v14 = vpop.f32.mrf.mxu1  ;;  %v6636_v11 = vpop.permute.xlu1 %3550 }
 0x3af   :  { %4170 = vst [vmem:[#allocation8 + $0x80] sm:$0xff] %v4075_v14  ;;  %v3626_v14 = vsel %vm3625_vm1, %v3624_v35, %v3619_v29 }
 0x3b3   :  { %v4830_v54 = vpop.f32.mrf.mxu1  ;;  %v6646_v27 = vpop.permute.xlu0 %3589 }
 0x3b4   :  { %4173 = vst [vmem:[#allocation8 + $0x98] sm:$0xff] %v4830_v54  ;;  %v3638_v54 = vrot.slane %v6618_v5, %v3637_v61 }
 0x3b5   :  { %v4085_v45 = vpop.f32.mrf.mxu1 }
 0x3b6   :  { %4172 = vst [vmem:[#allocation8 + $0x90] sm:$0xff] %v4085_v45 }
 0x3b9   :  { %v4833_v23 = vpop.f32.mrf.mxu1  ;;  %v3563_v22 = vpop.permute.xlu1 %3562 }
 0x3ba   :  { %4175 = vst [vmem:[#allocation8 + $0xa8] sm:$0xff] %v4833_v23  ;;  %v3721_v4 = vrot.slane %v3563_v22, %v3611_v59  ;;  %v3658_v22 = vsub.s32 %v3655_v26, %v5618_v31  ;;  %v3676_v59 = vadd.s32 4294967216, %v6774_v42 }
 0x3bb   :  { %v4095_v7 = vpop.f32.mrf.mxu1 }
 0x3bc   :  { %4174 = vst [vmem:[#allocation8 + $0xa0] sm:$0xff] %v4095_v7  ;;  %v3726_v33 = vsel %vm3618_vm0, %v3725_v3, %v3721_v4  ;;  %v3631_v7 = vrot.slane %v6612_v40, %v3630_v56  ;;  %v3652_v40 = vrot.slane %v6622_v12, %v3651_v49  ;;  %v3755_v9 = vrot.slane %v6638_v37, %v3658_v22 }
 0x3bd   :  { %v3666_v12 = vrot.slane %v6624_v47, %v3665_v48  ;;  %v3683_v37 = vadd.s32 4294967208, %v6774_v42  ;;  %v3659_v4 = vrot.slane %v6620_v39, %v3658_v22  ;;  %v3690_v3 = vadd.s32 4294967200, %v6774_v42 }
 0x3be   :  { %v6657_v0 = vpop.permute.xlu0 %3595 }
 0x3c3   :  { %v3569_v32 = vpop.permute.xlu1 %3568 }
 0x3c4   :  { %v3730_v55 = vrot.slane %v3569_v32, %v3623_v52  ;;  %v3633_v32 = vsel %vm3632_vm2, %v3631_v7, %v3626_v14 }
 0x3c5   :  { %v4836_v34 = vpop.f32.mrf.mxu1  ;;  %v3640_v28 = vsel %vm3639_vm3, %v3638_v54, %v3633_v32 }
 0x3c6   :  { %4177 = vst [vmem:[#allocation8 + $0xb8] sm:$0xff] %v4836_v34  ;;  %v3731_v13 = vsel %vm3625_vm1, %v3730_v55, %v3726_v33  ;;  %v3669_v34 = vadd.s32 4294967224, %v6774_v42  ;;  %v3679_v55 = vsub.s32 %v3676_v59, %v5618_v31 }
 0x3c7   :  { %v4105_v20 = vpop.f32.mrf.mxu1  ;;  %v3736_v60 = vsel %vm3632_vm2, %v3735_v15, %v3731_v13  ;;  %v3697_v15 = vadd.s32 4294967192, %v6774_v42 }
 0x3c8   :  { %4176 = vst [vmem:[#allocation8 + $0xb0] sm:$0xff] %v4105_v20  ;;  %v3680_v39 = vrot.slane %v6630_v53, %v3679_v55 }
 0x3c9   :  { %v3575_v2 = vpop.permute.xlu1 %3574 }
 0x3ca   :  { %v3740_v8 = vrot.slane %v3575_v2, %v3637_v61  ;;  %v3672_v2 = vsub.s32 %v3669_v34, %v5618_v31 }
 0x3cc   :  { %v3741_v46 = vsel %vm3639_vm3, %v3740_v8, %v3736_v60  ;;  %v3704_v8 = vadd.s32 4294967184, %v6774_v42  ;;  %v3673_v35 = vrot.slane %v6632_v19, %v3672_v2  ;;  %v3700_v19 = vsub.s32 %v3697_v15, %v5618_v31 }
 0x3cd   :  { %v3746_v20 = vsel %vm3646_vm4, %v3745_v57, %v3741_v46 }
 0x3ce   :  { %v3593_v25 = vpop.permute.xlu0 %3592  ;;  %v3707_v29 = vsub.s32 %v3704_v8, %v5618_v31  ;;  %v3701_v7 = vrot.slane %v6634_v24, %v3700_v19 }
 0x3cf   :  { %v3770_v51 = vrot.slane %v3593_v25, %v3679_v55 }
 0x3d1   :  { %v4839_v63 = vpop.f32.mrf.mxu1 }
 0x3d2   :  { %4179 = vst [vmem:[#allocation8 + $0xc8] sm:$0xff] %v4839_v63  ;;  %v3645_v63 = vrot.slane %v6616_v43, %v3644_v30  ;;  %v3765_v43 = vrot.slane %v6646_v27, %v3672_v2  ;;  %v3693_v27 = vsub.s32 %v3690_v3, %v5618_v31 }
 0x3d3   :  { %v4115_v50 = vpop.f32.mrf.mxu1  ;;  %v3581_v1 = vpop.permute.xlu1 %3580 }
 0x3d4   :  { %4178 = vst [vmem:[#allocation8 + $0xc0] sm:$0xff] %v4115_v50  ;;  %v3750_v16 = vrot.slane %v3581_v1, %v3651_v49  ;;  %v3647_v52 = vsel %vm3646_vm4, %v3645_v63, %v3640_v28  ;;  %v3686_v1 = vsub.s32 %v3683_v37, %v5618_v31  ;;  %v3694_v60 = vrot.slane %v6636_v11, %v3693_v27 }
 0x3d5   :  { %v3654_v17 = vsel %vm3653_vm5, %v3652_v40, %v3647_v52 }
 0x3d6   :  { %v3751_v5 = vsel %vm3653_vm5, %v3750_v16, %v3746_v20  ;;  %v3661_v56 = vsel %vm3660_vm6, %v3659_v4, %v3654_v17  ;;  %v3775_v10 = vrot.slane %v6657_v0, %v3686_v1  ;;  %v3687_v46 = vrot.slane %v6626_v44, %v3686_v1 }
 0x3d7   :  { %v3756_v50 = vsel %vm3660_vm6, %v3755_v9, %v3751_v5  ;;  %v3668_v47 = vsel %vm3667_vm7, %v3666_v12, %v3661_v56  ;;  %v3714_v0 = vsub.s32 %v3711_v6, %v5618_v31 }
 0x3d8   :  { %v3602_v38 = vpop.permute.xlu0 %3601  ;;  %v3675_v30 = vsel %vm3674_vm8, %v3673_v35, %v3668_v47 }
 0x3d9   :  { %v3682_v53 = vsel %vm3681_vm9, %v3680_v39, %v3675_v30  ;;  %v3785_v54 = vrot.slane %v3602_v38, %v3700_v19 }
 0x3da   :  { %v3689_v42 = vsel %vm3688_vm10, %v3687_v46, %v3682_v53 }
 0x3dd   :  { %v4842_v62 = vpop.f32.mrf.mxu1 }
 0x3de   :  { %4181 = vst [vmem:[#allocation8 + $0xd8] sm:$0xff] %v4842_v62  ;;  %v3587_v45 = vpop.permute.xlu1 %3586 }
 0x3df   :  { %v4125_v23 = vpop.f32.mrf.mxu1  ;;  %v3760_v41 = vrot.slane %v3587_v45, %v3665_v48  ;;  %v3696_v45 = vsel %vm3695_vm11, %v3694_v60, %v3689_v42 }
 0x3e0   :  { %4180 = vst [vmem:[#allocation8 + $0xd0] sm:$0xff] %v4125_v23  ;;  %v3703_v34 = vsel %vm3702_vm12, %v3701_v7, %v3696_v45 }
 0x3e1   :  { %v3761_v36 = vsel %vm3667_vm7, %v3760_v41, %v3756_v50 }
 0x3e2   :  { %v3766_v21 = vsel %vm3674_vm8, %v3765_v43, %v3761_v36 }
 0x3e3   :  { %v3771_v58 = vsel %vm3681_vm9, %v3770_v51, %v3766_v21  ;;  %v3599_v13 = vpop.permute.xlu0 %3598 }
 0x3e4   :  { %v3776_v26 = vsel %vm3688_vm10, %v3775_v10, %v3771_v58  ;;  %v3780_v62 = vrot.slane %v3599_v13, %v3693_v27 }
 0x3e6   :  { %v3781_v16 = vsel %vm3695_vm11, %v3780_v62, %v3776_v26 }
 0x3e7   :  { %v3786_v44 = vsel %vm3702_vm12, %v3785_v54, %v3781_v16 }
 0x3e8   :  { %v4845_v61 = vpop.f32.mrf.mxu1  ;;  %v3557_v49 = vpop.permute.xlu1 %3556 }
 0x3e9   :  { %4183 = vst [vmem:[#allocation8 + $0xe8] sm:$0xff] %v4845_v61  ;;  %v3708_v11 = vrot.slane %v3557_v49, %v3707_v29 }
 0x3ea   :  { %v4135_v33 = vpop.f32.mrf.mxu1 }
 0x3eb   :  { %4182 = vst [vmem:[#allocation8 + $0xe0] sm:$0xff] %v4135_v33  ;;  %v3710_v22 = vsel %vm3709_vm13, %v3708_v11, %v3703_v34 }
 0x3ed   :  { %v3605_v14 = vpop.permute.xlu0 %3604 }
 0x3ee   :  { %v3790_v25 = vrot.slane %v3605_v14, %v3707_v29 }
 0x3f0   :  { %v3791_v20 = vsel %vm3709_vm13, %v3790_v25, %v3786_v44 }
 0x3f3   :  { %v3560_v57 = vpop.permute.xlu1 %3559 }
 0x3f4   :  { %v4848_v23 = vpop.f32.mrf.mxu1  ;;  %v3715_v48 = vrot.slane %v3560_v57, %v3714_v0 }
 0x3f5   :  { %4185 = vst [vmem:[#allocation8 + $0xf8] sm:$0xff] %v4848_v23 }
 0x3f6   :  { %v4145_v31 = vpop.f32.mrf.mxu1 }
 0x3f7   :  { %4184 = vst [vmem:[#allocation8 + $0xf0] sm:$0xff] %v4145_v31 }
 0x3f8   :  { %v3608_v32 = vpop.permute.xlu0 %3607 }
 0x3f9   :  { %4937 = shalt.err (!%p4934_p5)
}
 0x3fa   :  { %4494 = dma.vmem_to_hbm [thread:$0]  %s4489_s13, 4096, %s6732_s4, [#allocation4], %s4996_s26, %s4996_s26, %s4997_s27   ;;  %v3717_v24 = vsel %vm3716_vm14, %v3715_v48, %v3710_v22  ;;  %v3795_v5 = vrot.slane %v3608_v32, %v3714_v0  ;;  %v6775_v9 = vlaneseq }
 0x3fb   :  { %s5003_s17 = smov [#allocation9]   ;;  %s5004_s19 = smov [#allocation11]  }
 0x3fc   :  { %v3796_v41 = vsel %vm3716_vm14, %v3795_v5, %v3791_v20  ;;  %s4501_s18 = sshll.u32 %s5003_s17, 4  ;;  %s4511_s20 = sshll.u32 %s5004_s19, 4  ;;  %vm3814_vm15 = vcmp.lt.s32.totalorder %v6775_v9, 256  ;;  %s4502_s18 = int_to_ptr.vmem [resolvable:$true] %s4501_s18  ;;  %s4512_s20 = int_to_ptr.vmem [resolvable:$true] %s4511_s20 }
 0x3fd   :  { %v3797_v28 = vcombine.low %v3717_v24, %v3796_v41  ;;  %s4946_s4 = scalar_lea.vmem %s4502_s18, 32  ;;  %p4951_p7 = scmp.lt.s32.totalorder %s4502_s18, %s4502_s18 }
 0x3fe   :  { %p4947_p6 = scmp.ne.s32.totalorder %s4502_s18, %s4946_s4  ;;  %p4952_p8 = scmp.lt.s32.totalorder %s4946_s4, %s4946_s4 }
 0x3ff   :  { %v3804_v40 = vrot.slane %v3797_v28, %v5679_v18 }
 0x400   :  { %p4953_p9 = por %p4952_p8, %p4951_p7 }
 0x401   :  { %v3811_v63 = vrot.slane %v3804_v40, %v5679_v18 }
 0x402   :  { %p4954_p10 = pnand %p4953_p9, %p4947_p6 }
 0x403   :  { %3816 = vst.msk [vmem:[#allocation9] sm:$0x3] %vm3814_vm15, %v3811_v63 }
 0x404   :  { %4957 = shalt.err (!%p4954_p10)
}
 0x405   :  { %4504 = dma.vmem_to_hbm [thread:$0]  %s4502_s18, 32, %s6733_s5, [#allocation10]  }
 0x406   :  { %s4966_s23 = scalar_lea.vmem %s4512_s20, 16  ;;  %s4970_s24 = scalar_lea.vmem %s4512_s20, 32 }
 0x407   :  { %p4967_p11 = scmp.ne.s32.totalorder %s4512_s20, %s4966_s23  ;;  %p4971_p12 = scmp.lt.s32.totalorder %s4512_s20, %s4512_s20 }
 0x408   :  { %p4972_p13 = scmp.lt.s32.totalorder %s4970_s24, %s4966_s23 }
 0x40a   :  { %p4973_p0 = por %p4972_p13, %p4971_p12 }
 0x40c   :  { %p4974_p1 = pnand %p4973_p0, %p4967_p11 }
 0x40e   :  { %4977 = shalt.err (!%p4974_p1)
}
 0x40f   :  { %4514 = dma.vmem_to_hbm [thread:$0]  %s4512_s20, 16, %s6734_s6, [#allocation10]  }
 0x410   :  { %4990 = dma.done.wait [#allocation4], 4096  }
 0x411   :  { %4991 = vsyncadd [#allocation4], 4294963200 }
 0x412   :  { %4992 = dma.done.wait [#allocation10], 48  }
 0x413   :  { %4993 = vsyncadd [#allocation10], 4294967248 }
 0x414   :  { %4524 = vsyncpa [#allocation3], 1 }
 0x415   :  { %4525 = vsyncpa [#allocation6], 1 }
 0x416   :  { %4526 = vsyncpa [#allocation4], 1 }
 0x417   :  { %4527 = vsyncpa [#allocation10], 1 }

</bundles_post_ra>
